<compile_context>
chip_gen: v7x
topology: tpu7x:2x2x1
jax: 0.10.0
libtpu: 0.0.40
codegen_flags: <defaults>
</compile_context>

<pallas_src>
import functools

import jax
import jax.numpy as jnp
from jax.experimental import pallas as pl
from jax.experimental.pallas import tpu as pltpu


def _round_up(n, m):
    return ((n + m - 1) // m) * m


# ------------------------------- kernel --------------------------------------

def _vae_kernel(x_ref, w1_ref, b1_ref, wh_ref, bh_ref,
                dw1_ref, db1_ref, dw2_ref, db2_ref, eps_ref,
                xrec_ref, mustd_ref):
    # Encoder hidden: ReLU(x @ W1 + b1).  x arrives f32; the bf16 cast happens in-kernel
    # (free VPU filler) so the wrapper never does a separate pad/cast pass over x.
    x = x_ref[...].astype(jnp.bfloat16)
    h = jnp.dot(x, w1_ref[...], preferred_element_type=jnp.float32)
    h = jnp.maximum(h + b1_ref[...], 0.0)

    # Fused mu/logvar heads: one (TM, H) @ (H, 2*Lp) MXU push, static 128-aligned split.
    heads = jnp.dot(h.astype(jnp.bfloat16), wh_ref[...],
                    preferred_element_type=jnp.float32) + bh_ref[...]
    l_pad = heads.shape[1] // 2
    mu = heads[:, :l_pad]
    std = jnp.exp(0.5 * heads[:, l_pad:])              # EUP transcendental, f32

    # Reparameterization: z = mu + std * eps (stays in vregs, never touches HBM).
    z = mu + std * eps_ref[...]

    # Decoder: ReLU(z @ Wd1 + bd1) -> sigmoid(h2 @ Wd2 + bd2)
    h2 = jnp.dot(z.astype(jnp.bfloat16), dw1_ref[...],
                 preferred_element_type=jnp.float32)
    h2 = jnp.maximum(h2 + db1_ref[...], 0.0)
    logits = jnp.dot(h2.astype(jnp.bfloat16), dw2_ref[...],
                     preferred_element_type=jnp.float32) + db2_ref[...]

    # Lane-dense, unmasked stores. bf16 recon halves the dominant writeback bytes;
    # mu/std share one slab: mu in lanes [0:Lp], std in [Lp:2Lp].
    xrec_ref[...] = jax.nn.sigmoid(logits).astype(xrec_ref.dtype)
    mustd_ref[:, :l_pad] = mu
    mustd_ref[:, l_pad:] = std


# ------------------------------ wrappers --------------------------------------

def pack_params(enc_params, dec_params):
    """Pad weights to lane-dense output dims, fuse the mu/logvar heads, cast matmul
    weights to bf16 (biases stay f32).  Done once, outside the jitted forward."""
    w1, b1 = enc_params["w1"], enc_params["b1"]
    wmu, bmu = enc_params["w_mu"], enc_params["b_mu"]
    wlv, blv = enc_params["w_lv"], enc_params["b_lv"]
    dw1, db1 = dec_params["w1"], dec_params["b1"]
    dw2, db2 = dec_params["w2"], dec_params["b2"]

    d_in, hidden = w1.shape
    latent = wmu.shape[1]
    d_pad = _round_up(d_in, 128)
    h_pad = _round_up(hidden, 128)
    l_pad = _round_up(latent, 128)

    def pad2(a, rows, cols):
        return jnp.pad(a, ((0, rows - a.shape[0]), (0, cols - a.shape[1])))

    # Fused heads: columns [0:latent] = mu head, [l_pad:l_pad+latent] = logvar head.
    wh = jnp.zeros((h_pad, 2 * l_pad), jnp.float32)
    wh = wh.at[:hidden, :latent].set(wmu).at[:hidden, l_pad:l_pad + latent].set(wlv)
    bh = jnp.zeros((1, 2 * l_pad), jnp.float32)
    bh = bh.at[:, :latent].set(bmu).at[:, l_pad:l_pad + latent].set(blv)

    return {
        # W1 keeps its un-padded input dim (d_in) so x needs no feature padding.
        "w1": pad2(w1, d_in, h_pad).astype(jnp.bfloat16),
        "b1": pad2(b1, 1, h_pad),
        "wh": wh.astype(jnp.bfloat16),
        "bh": bh,
        "dw1": pad2(dw1, l_pad, h_pad).astype(jnp.bfloat16),
        "db1": pad2(db1, 1, h_pad),
        "dw2": pad2(dw2, h_pad, d_pad).astype(jnp.bfloat16),
        "db2": pad2(db2, 1, d_pad),
    }


def vae_forward(x_nchw, packed, eps, tm=256):
    """Forward pass, returns (x_recon, mu, std) like the PyTorch module.
    `tm` = batch row tile: use 128 on v5e, 256 on v6e/v7x for real batch sizes."""
    B, C, H, W = x_nchw.shape
    D = C * H * W
    L = eps.shape[1]

    d_in, h_pad = packed["w1"].shape
    assert d_in == D, (d_in, D)
    two_l = packed["wh"].shape[1]
    l_pad = two_l // 2
    d_pad = packed["dw2"].shape[1]

    # Row tile: multiple of 16 (bf16 sublane packing); clamp to the padded batch.
    tm = min(int(tm), _round_up(B, 16))
    tm = _round_up(tm, 16)
    b_pad = _round_up(B, tm)
    grid = (b_pad // tm,)

    x_p = jnp.pad(x_nchw.reshape(B, D), ((0, b_pad - B), (0, 0)))
    eps_p = jnp.pad(eps.astype(jnp.float32), ((0, b_pad - B), (0, l_pad - L)))

    row_spec = lambda cols: pl.BlockSpec((tm, cols), lambda i: (i, 0))
    const_spec = lambda shape: pl.BlockSpec(shape, lambda i: (0, 0))

    weight_bytes = sum(int(packed[k].size) * packed[k].dtype.itemsize for k in packed)
    cost = pl.CostEstimate(
        flops=2 * b_pad * (D * h_pad + h_pad * two_l + l_pad * h_pad + h_pad * d_pad),
        transcendentals=b_pad * (l_pad + d_pad),
        bytes_accessed=(x_p.size * 4 + eps_p.size * 4 + weight_bytes
                        + b_pad * d_pad * 2 + b_pad * two_l * 4),
    )

    xrec_p, mustd_p = pl.pallas_call(
        _vae_kernel,
        grid=grid,
        out_shape=(
            jax.ShapeDtypeStruct((b_pad, d_pad), jnp.bfloat16),   # recon (padded, bf16)
            jax.ShapeDtypeStruct((b_pad, two_l), jnp.float32),    # [mu | std] (padded)
        ),
        in_specs=[
            row_spec(D),                          # x tile (batch grid)
            const_spec(packed["w1"].shape),       # weights/biases: constant index_map
            const_spec(packed["b1"].shape),       #   -> VMEM-resident across all steps
            const_spec(packed["wh"].shape),
            const_spec(packed["bh"].shape),
            const_spec(packed["dw1"].shape),
            const_spec(packed["db1"].shape),
            const_spec(packed["dw2"].shape),
            const_spec(packed["db2"].shape),
            row_spec(l_pad),                      # eps tile (batch grid)
        ],
        out_specs=(row_spec(d_pad), row_spec(two_l)),
        compiler_params=pltpu.CompilerParams(
            dimension_semantics=("parallel",)),   # v7x: shard batch over both TCs
        cost_estimate=cost,
    )(x_p, packed["w1"], packed["b1"], packed["wh"], packed["bh"],
      packed["dw1"], packed["db1"], packed["dw2"], packed["db2"], eps_p)

    # TODO(synk): for D / hidden at real image scales, add a K-reduction grid axis
    # (last position, "arbitrary", pl.when-init f32 accumulator) instead of
    # whole-weight VMEM residency; needed before scaling on v7x's 64 MiB VMEM.
    x_recon = xrec_p[:B, :D].astype(jnp.float32).reshape(B, C, H, W)
    mu = mustd_p[:B, :L]
    std = mustd_p[:B, l_pad:l_pad + L]
    return x_recon, mu, std


# ------------------------------ param init ------------------------------------

def _linear_init(key, fan_in, fan_out):
    kw, kb = jax.random.split(key)
    bound = 1.0 / jnp.sqrt(fan_in)
    w = jax.random.uniform(kw, (fan_in, fan_out), jnp.float32, -bound, bound)
    b = jax.random.uniform(kb, (1, fan_out), jnp.float32, -bound, bound)
    return w, b


def init_params(key, d_in, hidden, latent):
    k1, k2, k3, k4, k5 = jax.random.split(key, 5)
    ew1, eb1 = _linear_init(k1, d_in, hidden)
    wmu, bmu = _linear_init(k2, hidden, latent)
    wlv, blv = _linear_init(k3, hidden, latent)
    dw1, db1 = _linear_init(k4, latent, hidden)
    dw2, db2 = _linear_init(k5, hidden, d_in)
    enc = {"w1": ew1, "b1": eb1, "w_mu": wmu, "b_mu": bmu, "w_lv": wlv, "b_lv": blv}
    dec = {"w1": dw1, "b1": db1, "w2": dw2, "b2": db2}
    return enc, dec


def vae_reference(x_nchw, enc, dec, eps):
    """Pure-JAX f32 reference of the original PyTorch forward."""
    B, C, H, W = x_nchw.shape
    x = x_nchw.reshape(B, -1)
    h = jnp.maximum(x @ enc["w1"] + enc["b1"], 0.0)
    mu = h @ enc["w_mu"] + enc["b_mu"]
    logvar = h @ enc["w_lv"] + enc["b_lv"]
    std = jnp.exp(0.5 * logvar)
    z = mu + std * eps
    h2 = jnp.maximum(z @ dec["w1"] + dec["b1"], 0.0)
    xr = jax.nn.sigmoid(h2 @ dec["w2"] + dec["b2"])
    return xr.reshape(B, C, H, W), mu, std


# --------------------------------- main ----------------------------------------

if __name__ == "__main__":
    # Small shapes consistent with the module's forward (x_size=(1, 28, 28)).
    B, C, H, W = 64, 1, 28, 28
    D = C * H * W          # 784
    HIDDEN = 128
    LATENT = 32            # scaled-down latent_size (module default is 200)
    TM = 32                # small row tile so the toy batch still exercises the grid
                           # (use 128 on v5e, 256 on v6e/v7x for real batches)

    key = jax.random.PRNGKey(0)
    k_x, k_eps, k_params = jax.random.split(key, 3)

    x = jax.random.uniform(k_x, (B, C, H, W), jnp.float32)       # image-like input
    eps = jax.random.normal(k_eps, (B, LATENT), jnp.float32)     # reparam noise
    enc_params, dec_params = init_params(k_params, D, HIDDEN, LATENT)
    packed = pack_params(enc_params, dec_params)                 # pad + fuse + bf16

    fwd = jax.jit(functools.partial(vae_forward, tm=TM))
    x_recon, mu, std = fwd(x, packed, eps)
    jax.block_until_ready((x_recon, mu, std))

    # shape / range checks
    assert x_recon.shape == (B, C, H, W)
    assert mu.shape == (B, LATENT) and std.shape == (B, LATENT)
    assert bool(jnp.all(std > 0.0))
    assert bool(jnp.all((x_recon >= 0.0) & (x_recon <= 1.0)))

    # numerical check vs. f32 reference (bf16 weights / bf16 recon -> loose tolerance)
    xr_ref, mu_ref, std_ref = vae_reference(x, enc_params, dec_params, eps)
    assert bool(jnp.allclose(x_recon, xr_ref, atol=5e-2))
    assert bool(jnp.allclose(mu, mu_ref, atol=5e-2))
    assert bool(jnp.allclose(std, std_ref, atol=5e-2))

    print("KERNEL_OK")
</pallas_src>

<mosaic_0001>
module attributes {stable_mosaic.version = 11 : i64} {
  func.func @_vae_kernel(%arg0: i32, %arg1: memref<32x784xf32, #tpu.memory_space<vmem>>, %arg2: memref<784x128xbf16, #tpu.memory_space<vmem>>, %arg3: memref<1x128xf32, #tpu.memory_space<vmem>>, %arg4: memref<128x256xbf16, #tpu.memory_space<vmem>>, %arg5: memref<1x256xf32, #tpu.memory_space<vmem>>, %arg6: memref<128x128xbf16, #tpu.memory_space<vmem>>, %arg7: memref<1x128xf32, #tpu.memory_space<vmem>>, %arg8: memref<128x896xbf16, #tpu.memory_space<vmem>>, %arg9: memref<1x896xf32, #tpu.memory_space<vmem>>, %arg10: memref<32x128xf32, #tpu.memory_space<vmem>>, %arg11: memref<32x896xbf16, #tpu.memory_space<vmem>>, %arg12: memref<32x256xf32, #tpu.memory_space<vmem>>) attributes {dimension_semantics = [#tpu.dimension_semantics<parallel>], iteration_bounds = array<i64: 2>, scalar_prefetch = 0 : i64, scratch_operands = 0 : i64, tpu.core_type = #tpu.core_type<tc>, window_params = [{transform_indices = @transform_0, window_bounds = array<i64: 32, 784>}, {pipeline_mode = #tpu.pipeline_mode<synchronous>, transform_indices = @transform_1, window_bounds = array<i64: 784, 128>}, {pipeline_mode = #tpu.pipeline_mode<synchronous>, transform_indices = @transform_2, window_bounds = array<i64: 1, 128>}, {pipeline_mode = #tpu.pipeline_mode<synchronous>, transform_indices = @transform_3, window_bounds = array<i64: 128, 256>}, {pipeline_mode = #tpu.pipeline_mode<synchronous>, transform_indices = @transform_4, window_bounds = array<i64: 1, 256>}, {pipeline_mode = #tpu.pipeline_mode<synchronous>, transform_indices = @transform_5, window_bounds = array<i64: 128, 128>}, {pipeline_mode = #tpu.pipeline_mode<synchronous>, transform_indices = @transform_6, window_bounds = array<i64: 1, 128>}, {pipeline_mode = #tpu.pipeline_mode<synchronous>, transform_indices = @transform_7, window_bounds = array<i64: 128, 896>}, {pipeline_mode = #tpu.pipeline_mode<synchronous>, transform_indices = @transform_8, window_bounds = array<i64: 1, 896>}, {transform_indices = @transform_9, window_bounds = array<i64: 32, 128>}, {transform_indices = @transform_10, window_bounds = array<i64: 32, 896>}, {transform_indices = @transform_11, window_bounds = array<i64: 32, 256>}]} {
    %c0 = arith.constant 0 : index
    %c0_0 = arith.constant 0 : index
    %0 = vector.load %arg1[%c0, %c0_0] : memref<32x784xf32, #tpu.memory_space<vmem>>, vector<32x784xf32>
    %1 = arith.truncf %0 : vector<32x784xf32> to vector<32x784xbf16>
    %c0_1 = arith.constant 0 : index
    %c0_2 = arith.constant 0 : index
    %2 = vector.load %arg2[%c0_1, %c0_2] : memref<784x128xbf16, #tpu.memory_space<vmem>>, vector<784x128xbf16>
    %cst = arith.constant dense<0.000000e+00> : vector<32x128xf32>
    %3 = tpu.matmul %1, %2, %cst {dimension_numbers = #tpu.dot_dimension_numbers<[1], [0], [0], [1], [0, 0, 1, 1], [], []>} : vector<32x784xbf16>, vector<784x128xbf16>, vector<32x128xf32> -> vector<32x128xf32>
    %c0_3 = arith.constant 0 : index
    %c0_4 = arith.constant 0 : index
    %4 = vector.load %arg3[%c0_3, %c0_4] : memref<1x128xf32, #tpu.memory_space<vmem>>, vector<1x128xf32>
    %5 = vector.broadcast %4 : vector<1x128xf32> to vector<32x128xf32>
    %6 = arith.addf %3, %5 : vector<32x128xf32>
    %cst_5 = arith.constant 0.000000e+00 : f32
    %7 = vector.broadcast %cst_5 : f32 to vector<32x128xf32>
    %8 = arith.maximumf %6, %7 : vector<32x128xf32>
    %9 = arith.truncf %8 : vector<32x128xf32> to vector<32x128xbf16>
    %c0_6 = arith.constant 0 : index
    %c0_7 = arith.constant 0 : index
    %10 = vector.load %arg4[%c0_6, %c0_7] : memref<128x256xbf16, #tpu.memory_space<vmem>>, vector<128x256xbf16>
    %cst_8 = arith.constant dense<0.000000e+00> : vector<32x256xf32>
    %11 = tpu.matmul %9, %10, %cst_8 {dimension_numbers = #tpu.dot_dimension_numbers<[1], [0], [0], [1], [0, 0, 1, 1], [], []>} : vector<32x128xbf16>, vector<128x256xbf16>, vector<32x256xf32> -> vector<32x256xf32>
    %c0_9 = arith.constant 0 : index
    %c0_10 = arith.constant 0 : index
    %12 = vector.load %arg5[%c0_9, %c0_10] : memref<1x256xf32, #tpu.memory_space<vmem>>, vector<1x256xf32>
    %13 = vector.broadcast %12 : vector<1x256xf32> to vector<32x256xf32>
    %14 = arith.addf %11, %13 : vector<32x256xf32>
    %15 = vector.extract_strided_slice %14 {offsets = [0, 0], sizes = [32, 128], strides = [1, 1]} : vector<32x256xf32> to vector<32x128xf32>
    %16 = vector.extract_strided_slice %14 {offsets = [0, 128], sizes = [32, 128], strides = [1, 1]} : vector<32x256xf32> to vector<32x128xf32>
    %cst_11 = arith.constant 5.000000e-01 : f32
    %17 = vector.broadcast %cst_11 : f32 to vector<32x128xf32>
    %18 = arith.mulf %17, %16 : vector<32x128xf32>
    %19 = math.exp %18 : vector<32x128xf32>
    %c0_12 = arith.constant 0 : index
    %c0_13 = arith.constant 0 : index
    %20 = vector.load %arg10[%c0_12, %c0_13] : memref<32x128xf32, #tpu.memory_space<vmem>>, vector<32x128xf32>
    %21 = arith.mulf %19, %20 : vector<32x128xf32>
    %22 = arith.addf %15, %21 : vector<32x128xf32>
    %23 = arith.truncf %22 : vector<32x128xf32> to vector<32x128xbf16>
    %c0_14 = arith.constant 0 : index
    %c0_15 = arith.constant 0 : index
    %24 = vector.load %arg6[%c0_14, %c0_15] : memref<128x128xbf16, #tpu.memory_space<vmem>>, vector<128x128xbf16>
    %cst_16 = arith.constant dense<0.000000e+00> : vector<32x128xf32>
    %25 = tpu.matmul %23, %24, %cst_16 {dimension_numbers = #tpu.dot_dimension_numbers<[1], [0], [0], [1], [0, 0, 1, 1], [], []>} : vector<32x128xbf16>, vector<128x128xbf16>, vector<32x128xf32> -> vector<32x128xf32>
    %c0_17 = arith.constant 0 : index
    %c0_18 = arith.constant 0 : index
    %26 = vector.load %arg7[%c0_17, %c0_18] : memref<1x128xf32, #tpu.memory_space<vmem>>, vector<1x128xf32>
    %27 = vector.broadcast %26 : vector<1x128xf32> to vector<32x128xf32>
    %28 = arith.addf %25, %27 : vector<32x128xf32>
    %cst_19 = arith.constant 0.000000e+00 : f32
    %29 = vector.broadcast %cst_19 : f32 to vector<32x128xf32>
    %30 = arith.maximumf %28, %29 : vector<32x128xf32>
    %31 = arith.truncf %30 : vector<32x128xf32> to vector<32x128xbf16>
    %c0_20 = arith.constant 0 : index
    %c0_21 = arith.constant 0 : index
    %32 = vector.load %arg8[%c0_20, %c0_21] : memref<128x896xbf16, #tpu.memory_space<vmem>>, vector<128x896xbf16>
    %cst_22 = arith.constant dense<0.000000e+00> : vector<32x896xf32>
    %33 = tpu.matmul %31, %32, %cst_22 {dimension_numbers = #tpu.dot_dimension_numbers<[1], [0], [0], [1], [0, 0, 1, 1], [], []>} : vector<32x128xbf16>, vector<128x896xbf16>, vector<32x896xf32> -> vector<32x896xf32>
    %c0_23 = arith.constant 0 : index
    %c0_24 = arith.constant 0 : index
    %34 = vector.load %arg9[%c0_23, %c0_24] : memref<1x896xf32, #tpu.memory_space<vmem>>, vector<1x896xf32>
    %35 = vector.broadcast %34 : vector<1x896xf32> to vector<32x896xf32>
    %36 = arith.addf %33, %35 : vector<32x896xf32>
    %37 = arith.negf %36 : vector<32x896xf32>
    %38 = math.exp %37 : vector<32x896xf32>
    %cst_25 = arith.constant 1.000000e+00 : f32
    %39 = vector.broadcast %cst_25 : f32 to vector<32x896xf32>
    %40 = arith.addf %39, %38 : vector<32x896xf32>
    %41 = arith.divf %39, %40 : vector<32x896xf32>
    %42 = arith.truncf %41 : vector<32x896xf32> to vector<32x896xbf16>
    %c0_26 = arith.constant 0 : index
    %c0_27 = arith.constant 0 : index
    %43 = vector.load %arg11[%c0_26, %c0_27] : memref<32x896xbf16, #tpu.memory_space<vmem>>, vector<32x896xbf16>
    tpu.vector_store %arg11[%c0_26, %c0_27], %42 {strides = array<i32>} : memref<32x896xbf16, #tpu.memory_space<vmem>>, vector<32x896xbf16>,
    %c0_28 = arith.constant 0 : index
    %c0_29 = arith.constant 0 : index
    %44 = vector.load %arg12[%c0_28, %c0_29] : memref<32x256xf32, #tpu.memory_space<vmem>>, vector<32x128xf32>
    tpu.vector_store %arg12[%c0_28, %c0_29], %15 {strides = array<i32>} : memref<32x256xf32, #tpu.memory_space<vmem>>, vector<32x128xf32>,
    %c0_30 = arith.constant 0 : index
    %c128 = arith.constant 128 : index
    %45 = vector.load %arg12[%c0_30, %c128] : memref<32x256xf32, #tpu.memory_space<vmem>>, vector<32x128xf32>
    tpu.vector_store %arg12[%c0_30, %c128], %19 {strides = array<i32>} : memref<32x256xf32, #tpu.memory_space<vmem>>, vector<32x128xf32>,
    return
  }
  func.func @transform_0(%arg0: i32) -> (i32, i32) {
    %c0_i32 = arith.constant 0 : i32
    %c0_i32_0 = arith.constant 0 : i32
    return %arg0, %c0_i32 : i32, i32
  }
  func.func @transform_1(%arg0: i32) -> (i32, i32) {
    %c0_i32 = arith.constant 0 : i32
    %c0_i32_0 = arith.constant 0 : i32
    %c0_i32_1 = arith.constant 0 : i32
    return %c0_i32, %c0_i32_0 : i32, i32
  }
  func.func @transform_2(%arg0: i32) -> (i32, i32) {
    %c0_i32 = arith.constant 0 : i32
    %c0_i32_0 = arith.constant 0 : i32
    %c0_i32_1 = arith.constant 0 : i32
    return %c0_i32, %c0_i32_0 : i32, i32
  }
  func.func @transform_3(%arg0: i32) -> (i32, i32) {
    %c0_i32 = arith.constant 0 : i32
    %c0_i32_0 = arith.constant 0 : i32
    %c0_i32_1 = arith.constant 0 : i32
    return %c0_i32, %c0_i32_0 : i32, i32
  }
  func.func @transform_4(%arg0: i32) -> (i32, i32) {
    %c0_i32 = arith.constant 0 : i32
    %c0_i32_0 = arith.constant 0 : i32
    %c0_i32_1 = arith.constant 0 : i32
    return %c0_i32, %c0_i32_0 : i32, i32
  }
  func.func @transform_5(%arg0: i32) -> (i32, i32) {
    %c0_i32 = arith.constant 0 : i32
    %c0_i32_0 = arith.constant 0 : i32
    %c0_i32_1 = arith.constant 0 : i32
    return %c0_i32, %c0_i32_0 : i32, i32
  }
  func.func @transform_6(%arg0: i32) -> (i32, i32) {
    %c0_i32 = arith.constant 0 : i32
    %c0_i32_0 = arith.constant 0 : i32
    %c0_i32_1 = arith.constant 0 : i32
    return %c0_i32, %c0_i32_0 : i32, i32
  }
  func.func @transform_7(%arg0: i32) -> (i32, i32) {
    %c0_i32 = arith.constant 0 : i32
    %c0_i32_0 = arith.constant 0 : i32
    %c0_i32_1 = arith.constant 0 : i32
    return %c0_i32, %c0_i32_0 : i32, i32
  }
  func.func @transform_8(%arg0: i32) -> (i32, i32) {
    %c0_i32 = arith.constant 0 : i32
    %c0_i32_0 = arith.constant 0 : i32
    %c0_i32_1 = arith.constant 0 : i32
    return %c0_i32, %c0_i32_0 : i32, i32
  }
  func.func @transform_9(%arg0: i32) -> (i32, i32) {
    %c0_i32 = arith.constant 0 : i32
    %c0_i32_0 = arith.constant 0 : i32
    return %arg0, %c0_i32 : i32, i32
  }
  func.func @transform_10(%arg0: i32) -> (i32, i32) {
    %c0_i32 = arith.constant 0 : i32
    %c0_i32_0 = arith.constant 0 : i32
    return %arg0, %c0_i32 : i32, i32
  }
  func.func @transform_11(%arg0: i32) -> (i32, i32) {
    %c0_i32 = arith.constant 0 : i32
    %c0_i32_0 = arith.constant 0 : i32
    return %arg0, %c0_i32 : i32, i32
  }
}

</mosaic_0001>

<bundles_post_ra>
// kernel: vae_forward.1
= control target key start
LH: loop header
LB: loop body
LE: loop exit
PB: predicated region body
PF: predicated region fallthrough
CT: control target
= control target key end

     0   :  { %s3104_s17 = smov 0   ;;  %s3664_s0 = inlined_call_operand.vmem [shape: f32[64,784], index: 0, kind: input, shape index: {}]   ;;  %s3665_s1 = inlined_call_operand.vmem [shape: bf16[784,128], index: 1, kind: input, shape index: {}]   ;;  %s3666_s2 = inlined_call_operand.vmem [shape: f32[1,128], index: 2, kind: input, shape index: {}]   ;;  %s3667_s3 = inlined_call_operand.vmem [shape: bf16[128,256], index: 3, kind: input, shape index: {}]   ;;  %s3668_s4 = inlined_call_operand.vmem [shape: f32[1,256], index: 4, kind: input, shape index: {}]   ;;  %s3669_s5 = inlined_call_operand.vmem [shape: bf16[128,128], index: 5, kind: input, shape index: {}]   ;;  %s3670_s6 = inlined_call_operand.vmem [shape: f32[1,128], index: 6, kind: input, shape index: {}]   ;;  %s3671_s7 = inlined_call_operand.vmem [shape: bf16[128,896], index: 7, kind: input, shape index: {}]   ;;  %s3672_s8 = inlined_call_operand.vmem [shape: f32[1,896], index: 8, kind: input, shape index: {}]   ;;  %s3673_s9 = inlined_call_operand.vmem [shape: f32[64,128], index: 9, kind: input, shape index: {}]   ;;  %s3674_s10 = inlined_call_operand.vmem [shape: bf16[64,896], index: 10, kind: output, shape index: {0}]   ;;  %s3675_s11 = inlined_call_operand.vmem [shape: f32[64,256], index: 11, kind: output, shape index: {1}]  }
   0x1 LB: > { %s2380_s18 = sadd.s32 4294967295, %s3041_s17   ;;  %p2384_p0 = scmp.ge.s32.totalorder %s3041_s17, 1  ;;  %s3041_s17 = sphi %s3104_s17, %s22_s17  }
   0x2   : > { %p353_p1 = scmp.lt.s32.totalorder %s3041_s17, 3 }
   0x4   : > { %p354_p2 = pnand %p2384_p0, %p353_p1 }
   0x5   : > { %v2754_v0 = vld [vmem:[%s3665_s1 + $0x40] sm:$0xff] (!%p354_p2)   ;;  %v2758_v4 = vld [vmem:[%s3665_s1 + $0x48] sm:$0xff] (!%p354_p2)   ;;  %v2762_v8 = vld [vmem:[%s3665_s1 + $0x50] sm:$0xff] (!%p354_p2)   ;;  %s2385_s30 = sshll.u32 (!%p354_p2), %s2380_s18, 2  ;;  %vm875_vm0 = vcmask (!%p354_p2), 130048  }
   0x6   : > { %357 = sbr.rel (%p354_p2) target bundleno = 1059 (0x423), region = 60  ;;  %v2755_v1 = vld [vmem:[%s3665_s1] sm:$0xff] (!%p354_p2)   ;;  %2590 = vmatprep.subr.bf16.mxu0 (!%p354_p2), %v2754_v0  ;;  %v2759_v5 = vld [vmem:[%s3665_s1 + $0x8] sm:$0xff] (!%p354_p2)   ;;  %v2763_v9 = vld [vmem:[%s3665_s1 + $0x10] sm:$0xff] (!%p354_p2)   ;;  %p407_p3 = scmp.lt.s32.totalorder (!%p354_p2), %s2385_s30, 7 }
   0x7   : > { %v2756_v2 = vld [vmem:[%s3665_s1 + $0xc0] sm:$0xff] (!%p354_p2)   ;;  %2591 = vmatpush3.bf16.msra.mxu0 (!%p354_p2), %v2755_v1  ;;  %v2760_v6 = vld [vmem:[%s3665_s1 + $0xc8] sm:$0xff] (!%p354_p2)   ;;  %v2764_v10 = vld [vmem:[%s3665_s1 + $0xd0] sm:$0xff] (!%p354_p2)  }
   0x8   : > { %v2757_v3 = vld [vmem:[%s3665_s1 + $0x80] sm:$0xff] (!%p354_p2)   ;;  %2618 = vmatprep.subr.bf16.mxu1 (!%p354_p2), %v2756_v2  ;;  %2592 = vmatprep.subr.bf16.mxu0 (!%p354_p2), %v2758_v4  ;;  %v2761_v7 = vld [vmem:[%s3665_s1 + $0x88] sm:$0xff] (!%p354_p2)   ;;  %v2765_v11 = vld [vmem:[%s3665_s1 + $0x90] sm:$0xff] (!%p354_p2)  }
   0x9   : > { %2619 = vmatpush3.bf16.msra.mxu1 (!%p354_p2), %v2757_v3  ;;  %v2766_v12 = vld [vmem:[%s3665_s1 + $0x58] sm:$0xff] (!%p354_p2)   ;;  %v2770_v16 = vld [vmem:[%s3665_s1 + $0x60] sm:$0xff] (!%p354_p2)   ;;  %v2774_v20 = vld [vmem:[%s3665_s1 + $0x68] sm:$0xff] (!%p354_p2)  }
   0xa   : > { %2620 = vmatprep.subr.bf16.mxu1 (!%p354_p2), %v2760_v6  ;;  %v2767_v13 = vld [vmem:[%s3665_s1 + $0x18] sm:$0xff] (!%p354_p2)   ;;  %v2771_v17 = vld [vmem:[%s3665_s1 + $0x20] sm:$0xff] (!%p354_p2)   ;;  %v2775_v21 = vld [vmem:[%s3665_s1 + $0x28] sm:$0xff] (!%p354_p2)  }
   0xb   : > { %2593 = vmatpush3.bf16.msra.mxu0 (!%p354_p2), %v2759_v5  ;;  %v2768_v14 = vld [vmem:[%s3665_s1 + $0xd8] sm:$0xff] (!%p354_p2)   ;;  %v2772_v18 = vld [vmem:[%s3665_s1 + $0xe0] sm:$0xff] (!%p354_p2)   ;;  %v2776_v22 = vld [vmem:[%s3665_s1 + $0xe8] sm:$0xff] (!%p354_p2)  }
   0xc   : > { %2594 = vmatprep.subr.bf16.mxu0 (!%p354_p2), %v2762_v8  ;;  %v2769_v15 = vld [vmem:[%s3665_s1 + $0x98] sm:$0xff] (!%p354_p2)   ;;  %v2773_v19 = vld [vmem:[%s3665_s1 + $0xa0] sm:$0xff] (!%p354_p2)   ;;  %v2777_v23 = vld [vmem:[%s3665_s1 + $0xa8] sm:$0xff] (!%p354_p2)  }
   0xd   : > { %2621 = vmatpush3.bf16.msra.mxu1 %v2761_v7  ;;  %s3677_s30 = smov (!%p407_p3, %s2385_s30), 7  ;;  %v2778_v24 = vld [vmem:[%s3665_s1 + $0x70] sm:$0xff]   ;;  %v2782_v28 = vld [vmem:[%s3665_s1 + $0x78] sm:$0xff]   ;;  %v2786_v38 = vld [vmem:[%s3665_s1 + $0x140] sm:$0xff]  }
   0xe   : > { %2622 = vmatprep.subr.bf16.mxu1 %v2764_v10  ;;  %s2743_s19 = smul.u32 56, %s3677_s30  ;;  %v2779_v25 = vld [vmem:[%s3665_s1 + $0x30] sm:$0xff]   ;;  %v2783_v29 = vld [vmem:[%s3665_s1 + $0x38] sm:$0xff]   ;;  %v2787_v42 = vld [vmem:[%s3665_s1 + $0x100] sm:$0xff]   ;;  %s2573_s13 = sshll.u32 %s3677_s30, 4 }
   0xf   : > { %2595 = vmatpush3.bf16.msra.mxu0 %v2763_v9  ;;  %v2780_v26 = vld [vmem:[%s3665_s1 + $0xf0] sm:$0xff]   ;;  %v2784_v30 = vld [vmem:[%s3665_s1 + $0xf8] sm:$0xff]   ;;  %v2788_v46 = vld [vmem:[%s3665_s1 + $0x148] sm:$0xff]   ;;  %s3431_s16 = scalar_lea.vmem %s3675_s11, %s2573_s13  ;;  %s2744_s27 = smul.u32 28, %s3677_s30 }
  0x10   : > { %2596 = vmatprep.subr.bf16.mxu0 %v2766_v12  ;;  %v2781_v27 = vld [vmem:[%s3665_s1 + $0xb0] sm:$0xff]   ;;  %s3207_s29 = scalar_lea.vmem %s3664_s0, %s2743_s19  ;;  %v2785_v34 = vld [vmem:[%s3665_s1 + $0xb8] sm:$0xff]   ;;  %v2789_v47 = vld [vmem:[%s3665_s1 + $0x108] sm:$0xff]   ;;  %s2388_s19 = sshll.u32 %s3677_s30, 3 }
  0x11   : > { %2623 = vmatpush3.bf16.msra.mxu1 %v2765_v11  ;;  %v435_v31 = vld [vmem:[%s3207_s29 + $0x8] sm:$0xff]  ;;  %v442_v32 = vld [vmem:[%s3207_s29 + $0x40] sm:$0xff]  ;;  %v441_v36 = vld [vmem:[%s3207_s29 + $0x38] sm:$0xff]  ;;  %s417_s18 = scalar_lea.vmem %s3673_s9, %s2388_s19  ;;  %s3632_s28 = scalar_lea.vmem %s3674_s10, %s2744_s27 }
  0x12   : > { %2624 = vmatprep.subr.bf16.mxu1 %v2768_v14  ;;  %v463_v33 = vpack.c.bf16 %v442_v32, %v435_v31  ;;  %v434_v35 = vld [vmem:[%s3207_s29] sm:$0xff]  ;;  %v437_v39 = vld [vmem:[%s3207_s29 + $0x18] sm:$0xff]  ;;  %v444_v40 = vld [vmem:[%s3207_s29 + $0x50] sm:$0xff] }
  0x13   : > { %2597 = vmatpush3.bf16.msra.mxu0 %v2767_v13  ;;  %v462_v37 = vpack.c.bf16 %v441_v36, %v434_v35  ;;  %v465_v41 = vpack.c.bf16 %v444_v40, %v437_v39  ;;  %v436_v43 = vld [vmem:[%s3207_s29 + $0x10] sm:$0xff]  ;;  %v443_v44 = vld [vmem:[%s3207_s29 + $0x48] sm:$0xff]  ;;  %v2792_v50 = vld [vmem:[%s3665_s1 + $0x158] sm:$0xff]  }
  0x14   : > { %2598 = vmatprep.subr.bf16.mxu0 %v2770_v16  ;;  %914 = vmatprep.mubr.bf16.mxu0 %v463_v33  ;;  %v464_v45 = vpack.c.bf16 %v443_v44, %v436_v43  ;;  %v2790_v48 = vld [vmem:[%s3665_s1 + $0x150] sm:$0xff]   ;;  %v2793_v51 = vld [vmem:[%s3665_s1 + $0x118] sm:$0xff]   ;;  %v2794_v52 = vld [vmem:[%s3665_s1 + $0x160] sm:$0xff]   ;;  %v3043_v43 = vmov 0  }
  0x15   : > { %2625 = vmatpush3.bf16.msra.mxu1 %v2769_v15  ;;  %963 = vmatprep.mubr.bf16.mxu1 %v465_v41  ;;  %v2791_v49 = vld [vmem:[%s3665_s1 + $0x110] sm:$0xff]   ;;  %v2796_v53 = vld [vmem:[%s3665_s1 + $0x180] sm:$0xff]   ;;  %v449_v54 = vld [vmem:[%s3207_s29 + $0x78] sm:$0xff] }
  0x16   : > { %2626 = vmatprep.subr.bf16.mxu1 %v2772_v18  ;;  %v456_v55 = vld [vmem:[%s3207_s29 + $0xb0] sm:$0xff]  ;;  %v2795_v56 = vld [vmem:[%s3665_s1 + $0x120] sm:$0xff]   ;;  %v455_v59 = vld [vmem:[%s3207_s29 + $0xa8] sm:$0xff] }
  0x17   : > { %2599 = vmatpush3.bf16.msra.mxu0 %v2771_v17  ;;  %v470_v57 = vpack.c.bf16 %v456_v55, %v449_v54  ;;  %v448_v58 = vld [vmem:[%s3207_s29 + $0x70] sm:$0xff]  ;;  %v2797_v60 = vld [vmem:[%s3665_s1 + $0x168] sm:$0xff]   ;;  %v458_v63 = vld [vmem:[%s3207_s29 + $0xc0] sm:$0xff] }
  0x18   : > { %2600 = vmatprep.subr.bf16.mxu0 %v2774_v20  ;;  %v469_v61 = vpack.c.bf16 %v455_v59, %v448_v58  ;;  %v451_v62 = vld [vmem:[%s3207_s29 + $0x88] sm:$0xff]  ;;  %v450_v0 = vld [vmem:[%s3207_s29 + $0x80] sm:$0xff]  ;;  %v457_v2 = vld [vmem:[%s3207_s29 + $0xb8] sm:$0xff] }
  0x19   : > { %2627 = vmatpush3.bf16.msra.mxu1 %v2773_v19  ;;  %v472_v1 = vpack.c.bf16 %v458_v63, %v451_v62  ;;  %v471_v3 = vpack.c.bf16 %v457_v2, %v450_v0  ;;  %v2798_v4 = vld [vmem:[%s3665_s1 + $0x128] sm:$0xff]   ;;  %v2799_v5 = vld [vmem:[%s3665_s1 + $0x170] sm:$0xff]   ;;  %v446_v7 = vld [vmem:[%s3207_s29 + $0x60] sm:$0xff] }
  0x1a   : > { %2628 = vmatprep.subr.bf16.mxu1 %v2776_v22  ;;  %v439_v6 = vld [vmem:[%s3207_s29 + $0x28] sm:$0xff]  ;;  %v440_v9 = vld [vmem:[%s3207_s29 + $0x30] sm:$0xff]  ;;  %v454_v11 = vld [vmem:[%s3207_s29 + $0xa0] sm:$0xff] }
  0x1b   : > { %2601 = vmatpush3.bf16.msra.mxu0 %v2775_v21  ;;  %v467_v8 = vpack.c.bf16 %v446_v7, %v439_v6  ;;  %v447_v10 = vld [vmem:[%s3207_s29 + $0x68] sm:$0xff]  ;;  %v461_v12 = vld [vmem:[%s3207_s29 + $0xd8] sm:$0xff]  ;;  %v2800_v13 = vld [vmem:[%s3665_s1 + $0x130] sm:$0xff]  }
  0x1c   : > { %2602 = vmatprep.subr.bf16.mxu0 %v2778_v24  ;;  %v468_v14 = vpack.c.bf16 %v447_v10, %v440_v9  ;;  %v475_v15 = vpack.c.bf16 %v461_v12, %v454_v11  ;;  %v2801_v16 = vld [vmem:[%s3665_s1 + $0x178] sm:$0xff]   ;;  %v438_v18 = vld [vmem:[%s3207_s29 + $0x20] sm:$0xff]  ;;  %v460_v21 = vld [vmem:[%s3207_s29 + $0xd0] sm:$0xff] }
  0x1d   : > { %2629 = vmatpush3.bf16.msra.mxu1 %v2777_v23  ;;  %v2802_v17 = vld [vmem:[%s3665_s1 + $0x138] sm:$0xff]   ;;  %v452_v24 = vld [vmem:[%s3207_s29 + $0x90] sm:$0xff]  ;;  %v2809_v31 = vld [vmem:[%s3667_s3 + $0x20] ss:$8 sps:$4 sm:$0xff]  }
  0x1e   : > { %2630 = vmatprep.subr.bf16.mxu1 %v2780_v26  ;;  %v445_v19 = vld [vmem:[%s3207_s29 + $0x58] sm:$0xff]  ;;  %v2811_v32 = vld [vmem:[%s3667_s3 + $0x24] ss:$8 sps:$4 sm:$0xff]   ;;  %v2815_v36 = vld [vmem:[%s3667_s3 + $0x40] ss:$8 sps:$4 sm:$0xff]  }
  0x1f   : > { %2603 = vmatpush3.bf16.msra.mxu0 %v2779_v25  ;;  %v453_v20 = vld [vmem:[%s3207_s29 + $0x98] sm:$0xff]  ;;  %v466_v22 = vpack.c.bf16 %v445_v19, %v438_v18  ;;  %v459_v25 = vld [vmem:[%s3207_s29 + $0xc8] sm:$0xff] }
  0x20   : > { %2604 = vmatprep.subr.bf16.mxu0 %v2782_v28  ;;  %v474_v23 = vpack.c.bf16 %v460_v21, %v453_v20  ;;  %v473_v26 = vpack.c.bf16 %v459_v25, %v452_v24  ;;  %v2805_v28 = vld [vmem:[%s3667_s3 + $0x4] ss:$8 sps:$4 sm:$0xff]   ;;  %v2812_v33 = vld [vmem:[%s3667_s3 + $0x30] ss:$8 sps:$4 sm:$0xff]   ;;  %v2821_v40 = vld [vmem:[%s3667_s3 + $0x60] ss:$8 sps:$4 sm:$0xff]  }
  0x21   : > { %2631 = vmatpush3.bf16.msra.mxu1 %v2781_v27  ;;  %v2803_v27 = vld [vmem:[%s3667_s3] ss:$8 sps:$4 sm:$0xff]   ;;  %v2817_v35 = vld [vmem:[%s3667_s3 + $0x44] ss:$8 sps:$4 sm:$0xff]   ;;  %v2826_v41 = vld [vmem:[%s3667_s3 + $0x74] ss:$8 sps:$4 sm:$0xff]  }
  0x22   : > { %2632 = vmatprep.subr.bf16.mxu1 %v2784_v30  ;;  %v2806_v30 = vld [vmem:[%s3667_s3 + $0x10] ss:$8 sps:$4 sm:$0xff]   ;;  %v2823_v39 = vld [vmem:[%s3667_s3 + $0x64] ss:$8 sps:$4 sm:$0xff]  }
  0x23   : > { %2605 = vmatpush3.bf16.msra.mxu0 %v2783_v29  ;;  %v2808_v29 = vld [vmem:[%s3667_s3 + $0x14] ss:$8 sps:$4 sm:$0xff]  }
  0x24   : > { %2646 = vmatprep.subr.bf16.mxu0 %v2786_v38  ;;  %v2818_v38 = vld [vmem:[%s3667_s3 + $0x50] ss:$8 sps:$4 sm:$0xff]  }
  0x25   : > { %2633 = vmatpush3.bf16.msra.mxu1 %v2785_v34  ;;  %v2814_v34 = vld [vmem:[%s3667_s3 + $0x34] ss:$8 sps:$4 sm:$0xff]  }
  0x26   : > { %915 = vmatmul.mubr.bf16.vlgmr.msra.gmra.mrb[0].mxu0 %v462_v37  ;;  %2697 = vmatprep.subr.bf16.mxu1 %v2796_v53  ;;  %v2820_v37 = vld [vmem:[%s3667_s3 + $0x54] ss:$8 sps:$4 sm:$0xff]  }
  0x27   : > { %2647 = vmatpush3.bf16.msra.mxu0 %v2787_v42  ;;  %922 = vmatprep.mubr.bf16.mxu0 %v470_v57  ;;  %v2824_v42 = vld [vmem:[%s3667_s3 + $0x70] ss:$8 sps:$4 sm:$0xff]  }
  0x28   : > { %964 = vmatmul.mubr.bf16.vlgmr.msra.gmra.mrb[0].mxu1 %v464_v45  ;;  %2648 = vmatprep.subr.bf16.mxu0 %v2788_v46  ;;  %v2394_v45 = vld [vmem:[%s3666_s2] ss:$0 sm:$0xff] }
  0x29   : > { %2698 = vmatpush3.bf16.msra.mxu1 %v2796_v53  ;;  %971 = vmatprep.mubr.bf16.mxu1 %v472_v1 }
  0x2a   : > { %1192 = vmatprep.subr.bf16.mxu1 %v2805_v28 }
  0x2b   : > { %2649 = vmatpush3.bf16.msra.mxu0 %v2789_v47 }
  0x2c   : > { %2650 = vmatprep.subr.bf16.mxu0 %v2790_v48 }
  0x2e   : > { %923 = vmatmul.mubr.bf16.gmra.mrb[4].mxu0 %v469_v61 }
  0x2f   : > { %2651 = vmatpush3.bf16.msra.mxu0 %v2791_v49  ;;  %1012 = vmatprep.mubr.bf16.mxu0 %v467_v8 }
  0x30   : > { %2652 = vmatprep.subr.bf16.mxu0 %v2792_v50  ;;  %972 = vmatmul.mubr.bf16.gmra.mrb[4].mxu1 %v471_v3 }
  0x31   : > { %2699 = vmatprep.mubr.msk.bf16.mxu1 %vm875_vm0, %v468_v14 }
  0x33   : > { %2653 = vmatpush3.bf16.msra.mxu0 %v2793_v51 }
  0x34   : > { %2654 = vmatprep.subr.bf16.mxu0 %v2794_v52 }
  0x37   : > { %2655 = vmatpush3.bf16.msra.mxu0 %v2795_v56 }
  0x38   : > { %2656 = vmatprep.subr.bf16.mxu0 %v2797_v60  ;;  %2700 = vmatmul.mubr.msk.bf16.vlgmr.msra.gmra.mrb[8].mxu1 %vm875_vm0, %v475_v15 }
  0x39   : > { %1193 = vmatpush1.bf16.msra.mxu1 %v2803_v27  ;;  %1224 = vmatprep.mubr.bf16.mxu1 %v3043_v43 }
  0x3a   : > { %1194 = vmatprep.subr.bf16.mxu1 %v2808_v29 }
  0x3b   : > { %2657 = vmatpush3.bf16.msra.mxu0 %v2798_v4 }
  0x3c   : > { %2658 = vmatprep.subr.bf16.mxu0 %v2799_v5 }
  0x3d   : > { %1195 = vmatpush1.bf16.msra.mxu1 %v2806_v30 }
  0x3e   : > { %1196 = vmatprep.subr.bf16.mxu1 %v2811_v32 }
  0x3f   : > { %2659 = vmatpush3.bf16.msra.mxu0 %v2800_v13 }
  0x40   : > { %2660 = vmatprep.subr.bf16.mxu0 %v2801_v16 }
  0x41   : > { %1197 = vmatpush1.bf16.msra.mxu1 %v2809_v31 }
  0x42   : > { %1198 = vmatprep.subr.bf16.mxu1 %v2814_v34 }
  0x43   : > { %2661 = vmatpush3.bf16.msra.mxu0 %v2802_v17 }
  0x45   : > { %1199 = vmatpush1.bf16.msra.mxu1 %v2812_v33 }
  0x46   : > { %1013 = vmatmul.mubr.bf16.vlgmr.msra.gmra.mrb[8].mxu0 %v466_v22  ;;  %1200 = vmatprep.subr.bf16.mxu1 %v2817_v35 }
  0x47   : > { %1020 = vmatprep.mubr.bf16.mxu0 %v474_v23 }
  0x49   : > { %1201 = vmatpush1.bf16.msra.mxu1 %v2815_v36 }
  0x4a   : > { %1202 = vmatprep.subr.bf16.mxu1 %v2820_v37 }
  0x4d   : > { %1203 = vmatpush1.bf16.msra.mxu1 %v2818_v38 }
  0x4e   : > { %1021 = vmatmul.mubr.bf16.gmra.mrb[12].mxu0 %v473_v26  ;;  %1204 = vmatprep.subr.bf16.mxu1 %v2823_v39 }
  0x51   : > { %1205 = vmatpush1.bf16.msra.mxu1 %v2821_v40 }
  0x52   : > { %1206 = vmatprep.subr.bf16.mxu1 %v2826_v41 }
  0x55   : > { %1207 = vmatpush1.bf16.msra.mxu1 %v2824_v42 }
  0xf9   : > { %v2606_v44 = vpop.f32.mrb[0].mxu0 }
  0xfa   : > { %v2607_v46 = vpop.f32.mrb[1].mxu0 }
  0xfb   : > { %v2608_v47 = vadd.f32 %v2607_v46, %v2606_v44  ;;  %v2609_v48 = vpop.f32.mrb[2].mxu0  ;;  %v2634_v49 = vpop.f32.mrb[0].mxu1  ;;  %v2827_v44 = vld [vmem:[%s3669_s5] sm:$0xff]   ;;  %v2829_v46 = vld [vmem:[%s3669_s5 + $0x10] sm:$0xff]  }
  0xfc   : > { %v2610_v50 = vpop.f32.mrb[3].mxu0  ;;  %v2635_v53 = vpop.f32.mrb[1].mxu1  ;;  %2703 = vmatprep.subr.bf16.mxu0 %v2827_v44 }
  0xfd   : > { %v917_v51 = vadd.f32 %v2608_v47, %v2394_v45  ;;  %v2611_v52 = vadd.f32 %v2610_v50, %v2609_v48  ;;  %v2636_v54 = vadd.f32 %v2635_v53, %v2634_v49  ;;  %v2637_v55 = vpop.f32.mrb[2].mxu1  ;;  %2704 = vmatpush3.bf16.msra.mxu0 %v2827_v44  ;;  %v2830_v47 = vld [vmem:[%s3669_s5 + $0x18] sm:$0xff]   ;;  %v2831_v48 = vld [vmem:[%s3669_s5 + $0x20] sm:$0xff]   ;;  %v2832_v49 = vld [vmem:[%s3669_s5 + $0x28] sm:$0xff]  }
  0xfe   : > { %v2638_v57 = vpop.f32.mrb[3].mxu1  ;;  %v2833_v50 = vld [vmem:[%s3669_s5 + $0x30] sm:$0xff]   ;;  %v2837_v53 = vld [vmem:[%s3671_s7 + $0x4] ss:$28 sps:$4 sm:$0xff]   ;;  %v1260_v44 = vld [vmem:[%s417_s18 + $0x18] sm:$0xff] }
  0xff   : > { %v920_v56 = vadd.f32 %v2611_v52, %v2394_v45  ;;  %v966_v58 = vadd.f32 %v2636_v54, %v917_v51  ;;  %v2639_v59 = vadd.f32 %v2638_v57, %v2637_v55  ;;  %v2834_v51 = vld [vmem:[%s3669_s5 + $0x38] sm:$0xff]   ;;  %v2840_v54 = vld [vmem:[%s3671_s7 + $0xc] ss:$28 sps:$4 sm:$0xff]   ;;  %1786 = vmatprep.subr.bf16.mxu1 %v2837_v53  ;;  %v2849_v57 = vld [vmem:[%s3671_s7 + $0x74] ss:$28 sps:$4 sm:$0xff]  }
 0x100   : > { %v2835_v52 = vld [vmem:[%s3671_s7] ss:$28 sps:$4 sm:$0xff]  }
 0x101   : > { %v969_v60 = vadd.f32 %v2639_v59, %v920_v56  ;;  %v2612_v61 = vpop.f32.mrb[4].mxu0  ;;  %v2843_v55 = vld [vmem:[%s3671_s7 + $0x3c] ss:$28 sps:$4 sm:$0xff]   ;;  %v2855_v59 = vld [vmem:[%s3671_s7 + $0xac] ss:$28 sps:$4 sm:$0xff]  }
 0x102   : > { %v2613_v62 = vpop.f32.mrb[5].mxu0  ;;  %v2841_v56 = vld [vmem:[%s3671_s7 + $0x38] ss:$28 sps:$4 sm:$0xff]   ;;  %v2844_v53 = vld [vmem:[%s3671_s7 + $0x40] ss:$28 sps:$4 sm:$0xff]  }
 0x103   : > { %v2614_v63 = vadd.f32 %v2613_v62, %v2612_v61  ;;  %v2615_v0 = vpop.f32.mrb[6].mxu0  ;;  %v2640_v1 = vpop.f32.mrb[4].mxu1  ;;  %v2861_v61 = vld [vmem:[%s3671_s7 + $0xe4] ss:$28 sps:$4 sm:$0xff]  }
 0x104   : > { %v2616_v2 = vpop.f32.mrb[7].mxu0  ;;  %v2641_v5 = vpop.f32.mrb[5].mxu1  ;;  %v2859_v62 = vld [vmem:[%s3671_s7 + $0xe0] ss:$28 sps:$4 sm:$0xff]  }
 0x105   : > { %v925_v3 = vadd.f32 %v2614_v63, %v2394_v45  ;;  %v2617_v4 = vadd.f32 %v2616_v2, %v2615_v0  ;;  %v2642_v6 = vadd.f32 %v2641_v5, %v2640_v1  ;;  %v2643_v7 = vpop.f32.mrb[6].mxu1  ;;  %v2867_v63 = vld [vmem:[%s3671_s7 + $0x11c] ss:$28 sps:$4 sm:$0xff]   ;;  %v1102_v1 = vlaneseq }
 0x106   : > { %v2644_v9 = vpop.f32.mrb[7].mxu1  ;;  %v2865_v0 = vld [vmem:[%s3671_s7 + $0x118] ss:$28 sps:$4 sm:$0xff]  }
 0x107   : > { %v928_v8 = vadd.f32 %v2617_v4, %v2394_v45  ;;  %v974_v10 = vadd.f32 %v2642_v6, %v925_v3  ;;  %v2645_v11 = vadd.f32 %v2644_v9, %v2643_v7  ;;  %v2828_v45 = vld [vmem:[%s3669_s5 + $0x8] sm:$0xff]   ;;  %v3416_v2 = vshrl.u32 %v1102_v1, 7  ;;  %v1100_v4 = vld [vmem:[%s3668_s4] sm:$0x3]  ;;  %v2874_v1 = vld [vmem:[%s3671_s7 + $0x158] ss:$28 sps:$4 sm:$0xff]  }
 0x108   : > { %2705 = vmatprep.subr.bf16.mxu0 %v2828_v45 }
 0x109   : > { %v977_v12 = vadd.f32 %v2645_v11, %v928_v8  ;;  %2706 = vmatpush3.bf16.msra.mxu0 %v2828_v45  ;;  %v1104_v3 = vsub.s32 0, %v3416_v2  ;;  %v1108_v5 = vsub.s32 1, %v3416_v2 }
 0x10a   : > { %2707 = vmatprep.subr.bf16.mxu0 %v2829_v46 }
 0x10b   : > { %v2701_v13 = vpop.f32.mrb[8].mxu1  ;;  %v1105_v6 = vrot.slane %v1100_v4, %v1104_v3  ;;  %v1109_v7 = vrot.slane %v1100_v4, %v1108_v5  ;;  %v2879_v4 = vld [vmem:[%s3671_s7 + $0x18c] ss:$28 sps:$4 sm:$0xff]  }
 0x10c   : > { %v1063_v14 = vpop.f32.mrb[9].mxu1 }
 0x10d   : > { %v2702_v15 = vpop.f32.mrb[10].mxu1  ;;  %2708 = vmatpush3.bf16.msra.mxu0 %v2829_v46 }
 0x10e   : > { %v1066_v16 = vpop.f32.mrb[11].mxu1  ;;  %2709 = vmatprep.subr.bf16.mxu0 %v2830_v47 }
 0x111   : > { %2710 = vmatpush3.bf16.msra.mxu0 %v2830_v47 }
 0x112   : > { %2711 = vmatprep.subr.bf16.mxu0 %v2831_v48 }
 0x115   : > { %2712 = vmatpush3.bf16.msra.mxu0 %v2831_v48 }
 0x116   : > { %2713 = vmatprep.subr.bf16.mxu0 %v2832_v49 }
 0x119   : > { %v2662_v17 = vpop.f32.mrb[8].mxu0  ;;  %2714 = vmatpush3.bf16.msra.mxu0 %v2832_v49 }
 0x11a   : > { %v2663_v18 = vpop.f32.mrb[9].mxu0  ;;  %2715 = vmatprep.subr.bf16.mxu0 %v2833_v50 }
 0x11b   : > { %v2664_v19 = vadd.f32 %v2663_v18, %v2662_v17  ;;  %v2665_v20 = vpop.f32.mrb[10].mxu0 }
 0x11c   : > { %v2666_v21 = vpop.f32.mrb[11].mxu0 }
 0x11d   : > { %v1015_v22 = vadd.f32 %v2664_v19, %v966_v58  ;;  %v2667_v23 = vadd.f32 %v2666_v21, %v2665_v20  ;;  %2716 = vmatpush3.bf16.msra.mxu0 %v2833_v50  ;;  %v2847_v58 = vld [vmem:[%s3671_s7 + $0x70] ss:$28 sps:$4 sm:$0xff]   ;;  %v2838_v50 = vld [vmem:[%s3671_s7 + $0x8] ss:$28 sps:$4 sm:$0xff]  }
 0x11e   : > { %2717 = vmatprep.subr.bf16.mxu0 %v2834_v51 }
 0x11f   : > { %v1064_v24 = vadd.f32 %v1063_v14, %v1015_v22  ;;  %v1018_v25 = vadd.f32 %v2667_v23, %v969_v60  ;;  %v2853_v60 = vld [vmem:[%s3671_s7 + $0xa8] ss:$28 sps:$4 sm:$0xff]  }
 0x121   : > { %v1067_v26 = vadd.f32 %v1066_v16, %v1018_v25  ;;  %v2668_v27 = vpop.f32.mrb[12].mxu0  ;;  %v1078_v29 = vmax.f32 %v1064_v24, 0.0  ;;  %2718 = vmatpush3.bf16.msra.mxu0 %v2834_v51 }
 0x122   : > { %v2669_v28 = vpop.f32.mrb[13].mxu0  ;;  %1839 = vmatprep.subr.bf16.mxu0 %v2840_v54  ;;  %v2852_v54 = vld [vmem:[%s3671_s7 + $0x7c] ss:$28 sps:$4 sm:$0xff]  }
 0x123   : > { %v1079_v30 = vmax.f32 %v1067_v26, 0.0  ;;  %v2670_v31 = vadd.f32 %v2669_v28, %v2668_v27  ;;  %v2671_v32 = vpop.f32.mrb[14].mxu0 }
 0x124   : > { %v2672_v33 = vpop.f32.mrb[15].mxu0 }
 0x125   : > { %v1082_v34 = vpack.c.bf16 %v1079_v30, %v1078_v29  ;;  %v1023_v35 = vadd.f32 %v2670_v31, %v974_v10  ;;  %v2673_v36 = vadd.f32 %v2672_v33, %v2671_v32  ;;  %v1257_v32 = vld [vmem:[%s417_s18] sm:$0xff] }
 0x127   : > { %v1072_v37 = vadd.f32 %v2701_v13, %v1023_v35  ;;  %v1026_v38 = vadd.f32 %v2673_v36, %v977_v12  ;;  %1225 = vmatmul.mubr.bf16.vlgmr.msra.gmra.mrb[12].mxu1 %v1082_v34  ;;  %v1258_v34 = vld [vmem:[%s417_s18 + $0x8] sm:$0xff] }
 0x128   : > { %1234 = vmatprep.mubr.bf16.mxu1 %v3043_v43  ;;  %1787 = vmatpush1.bf16.msra.mxu1 %v2835_v52  ;;  %v2846_v52 = vld [vmem:[%s3671_s7 + $0x44] ss:$28 sps:$4 sm:$0xff]  }
 0x129   : > { %v1075_v39 = vadd.f32 %v2702_v15, %v1026_v38  ;;  %v1080_v40 = vmax.f32 %v1072_v37, 0.0  ;;  %1788 = vmatprep.subr.bf16.mxu1 %v2843_v55  ;;  %v2850_v55 = vld [vmem:[%s3671_s7 + $0x78] ss:$28 sps:$4 sm:$0xff]  }
 0x12b   : > { %v1081_v41 = vmax.f32 %v1075_v39, 0.0 }
 0x12c   : > { %1789 = vmatpush1.bf16.msra.mxu1 %v2841_v56  ;;  %v2858_v56 = vld [vmem:[%s3671_s7 + $0xb4] ss:$28 sps:$4 sm:$0xff]  }
 0x12d   : > { %v1083_v42 = vpack.c.bf16 %v1081_v41, %v1080_v40  ;;  %1790 = vmatprep.subr.bf16.mxu1 %v2849_v57  ;;  %v1259_v40 = vld [vmem:[%s417_s18 + $0x10] sm:$0xff] }
 0x12e   : > { %v2856_v57 = vld [vmem:[%s3671_s7 + $0xb0] ss:$28 sps:$4 sm:$0xff]  }
 0x12f   : > { %1235 = vmatmul.mubr.bf16.gmra.mrb[16].mxu1 %v1083_v42 }
 0x130   : > { %1818 = vmatprep.mubr.bf16.mxu1 %v3043_v43  ;;  %1791 = vmatpush1.bf16.msra.mxu1 %v2847_v58  ;;  %v2864_v58 = vld [vmem:[%s3671_s7 + $0xec] ss:$28 sps:$4 sm:$0xff]  }
 0x131   : > { %1792 = vmatprep.subr.bf16.mxu1 %v2855_v59  ;;  %v2862_v59 = vld [vmem:[%s3671_s7 + $0xe8] ss:$28 sps:$4 sm:$0xff]  }
 0x134   : > { %1793 = vmatpush1.bf16.msra.mxu1 %v2853_v60  ;;  %v2870_v60 = vld [vmem:[%s3671_s7 + $0x124] ss:$28 sps:$4 sm:$0xff]  }
 0x135   : > { %1794 = vmatprep.subr.bf16.mxu1 %v2861_v61  ;;  %v2868_v61 = vld [vmem:[%s3671_s7 + $0x120] ss:$28 sps:$4 sm:$0xff]  }
 0x138   : > { %1795 = vmatpush1.bf16.msra.mxu1 %v2859_v62  ;;  %v2873_v62 = vld [vmem:[%s3671_s7 + $0x154] ss:$28 sps:$4 sm:$0xff]  }
 0x139   : > { %1796 = vmatprep.subr.bf16.mxu1 %v2867_v63  ;;  %v2876_v63 = vld [vmem:[%s3671_s7 + $0x15c] ss:$28 sps:$4 sm:$0xff]  }
 0x13c   : > { %1797 = vmatpush1.bf16.msra.mxu1 %v2865_v0  ;;  %v2871_v0 = vld [vmem:[%s3671_s7 + $0x150] ss:$28 sps:$4 sm:$0xff]  }
 0x13d   : > { %1798 = vmatprep.subr.bf16.mxu1 %v2873_v62 }
 0x140   : > { %1799 = vmatpush1.bf16.msra.mxu1 %v2871_v0 }
 0x141   : > { %1800 = vmatprep.subr.bf16.mxu1 %v2879_v4 }
 0x1fa   : > { %v1226_v8 = vpop.f32.mrb[12].mxu1 }
 0x1fb   : > { %v1227_v9 = vadd.f32 %v1226_v8, %v1105_v6  ;;  %v1228_v10 = vpop.f32.mrb[13].mxu1  ;;  %v2880_v8 = vld [vmem:[%s3671_s7 + $0x190] ss:$28 sps:$4 sm:$0xff]  }
 0x1fc   : > { %v1229_v11 = vadd.f32 %v1228_v10, %v1109_v7  ;;  %v1230_v12 = vpop.f32.mrb[14].mxu1  ;;  %v2886_v10 = vld [vmem:[%s3671_s7 + $0x18] ss:$28 sps:$4 sm:$0xff]  }
 0x1fd   : > { %2266 = vst [vmem:[%s3431_s16] sm:$0xff] %v1227_v9  ;;  %v1231_v13 = vadd.f32 %v1230_v12, %v1105_v6  ;;  %v1232_v14 = vpop.f32.mrb[15].mxu1 }
 0x1fe   : > { %v1245_v15 = vmul.f32 0.5, %v1229_v11  ;;  %v1233_v16 = vadd.f32 %v1232_v14, %v1109_v7  ;;  %v2462_v11 = vld [vmem:[%s3670_s6] ss:$0 sm:$0xff] }
 0x1ff   : > { %2267 = vst [vmem:[%s3431_s16 + $0x10] sm:$0xff] %v1231_v13 }
 0x200   : > { %v1249_v17 = vmul.f32 1.442695, %v1245_v15  ;;  %v1246_v18 = vmul.f32 0.5, %v1233_v16 }
 0x202   : > { %2915 = vpow2.f32 %v1249_v17  ;;  %v1251_v19 = vmul.f32 1.442695, %v1246_v18  ;;  %v1236_v20 = vpop.f32.mrb[16].mxu1 }
 0x203   : > { %v1237_v21 = vadd.f32 %v1236_v20, %v1105_v6  ;;  %v1238_v22 = vpop.f32.mrb[17].mxu1 }
 0x204   : > { %2917 = vpow2.f32 %v1251_v19  ;;  %v1239_v23 = vadd.f32 %v1238_v22, %v1109_v7  ;;  %v1240_v24 = vpop.f32.mrb[18].mxu1 }
 0x205   : > { %2268 = vst [vmem:[%s3431_s16 + $0x20] sm:$0xff] %v1237_v21  ;;  %v1241_v25 = vadd.f32 %v1240_v24, %v1105_v6  ;;  %v1242_v26 = vpop.f32.mrb[19].mxu1  ;;  %v2882_v6 = vld [vmem:[%s3671_s7 + $0x194] ss:$28 sps:$4 sm:$0xff]  }
 0x206   : > { %v1247_v27 = vmul.f32 0.5, %v1239_v23  ;;  %v1243_v28 = vadd.f32 %v1242_v26, %v1109_v7  ;;  %v2877_v7 = vld [vmem:[%s3671_s7 + $0x188] ss:$28 sps:$4 sm:$0xff]  }
 0x207   : > { %2269 = vst [vmem:[%s3431_s16 + $0x30] sm:$0xff] %v1241_v25  ;;  %1801 = vmatpush1.bf16.msra.mxu1 %v2877_v7 }
 0x208   : > { %v1253_v29 = vmul.f32 1.442695, %v1247_v27  ;;  %v1248_v30 = vmul.f32 0.5, %v1243_v28  ;;  %v2889_v27 = vld [vmem:[%s3671_s7 + $0x4c] ss:$28 sps:$4 sm:$0xff]  }
 0x209   : > { %v2890_v28 = vld [vmem:[%s3671_s7 + $0x50] ss:$28 sps:$4 sm:$0xff]  }
 0x20a   : > { %2919 = vpow2.f32 %v1253_v29  ;;  %v1255_v31 = vmul.f32 1.442695, %v1248_v30  ;;  %v2887_v29 = vld [vmem:[%s3671_s7 + $0x48] ss:$28 sps:$4 sm:$0xff]  }
 0x20b   : > { %v2893_v30 = vld [vmem:[%s3671_s7 + $0x84] ss:$28 sps:$4 sm:$0xff]  }
 0x20c   : > { %v2916_v33 = vpop.eup %2915  ;;  %2921 = vpow2.f32 %v1255_v31  ;;  %v2894_v31 = vld [vmem:[%s3671_s7 + $0x88] ss:$28 sps:$4 sm:$0xff]  }
 0x20d   : > { %2270 = vst [vmem:[%s3431_s16 + $0x8] sm:$0xff] %v2916_v33  ;;  %v1261_v35 = vmul.f32 %v2916_v33, %v1257_v32  ;;  %v2891_v32 = vld [vmem:[%s3671_s7 + $0x80] ss:$28 sps:$4 sm:$0xff]  }
 0x20e   : > { %v2918_v36 = vpop.eup %2917  ;;  %v2897_v33 = vld [vmem:[%s3671_s7 + $0xbc] ss:$28 sps:$4 sm:$0xff]  }
 0x20f   : > { %2271 = vst [vmem:[%s3431_s16 + $0x18] sm:$0xff] %v2918_v36  ;;  %v1262_v37 = vmul.f32 %v2918_v36, %v1258_v34  ;;  %v1265_v38 = vadd.f32 %v1261_v35, %v1227_v9  ;;  %v2885_v9 = vld [vmem:[%s3671_s7 + $0x14] ss:$28 sps:$4 sm:$0xff]   ;;  %v2898_v34 = vld [vmem:[%s3671_s7 + $0xc0] ss:$28 sps:$4 sm:$0xff]  }
 0x210   : > { %1892 = vmatprep.subr.bf16.mxu1 %v2885_v9  ;;  %v2895_v35 = vld [vmem:[%s3671_s7 + $0xb8] ss:$28 sps:$4 sm:$0xff]  }
 0x211   : > { %v1266_v39 = vadd.f32 %v1262_v37, %v1231_v13  ;;  %v2901_v36 = vld [vmem:[%s3671_s7 + $0xf4] ss:$28 sps:$4 sm:$0xff]  }
 0x212   : > { %v2902_v37 = vld [vmem:[%s3671_s7 + $0xf8] ss:$28 sps:$4 sm:$0xff]  }
 0x213   : > { %v1269_v41 = vpack.c.bf16 %v1266_v39, %v1265_v38  ;;  %v2899_v38 = vld [vmem:[%s3671_s7 + $0xf0] ss:$28 sps:$4 sm:$0xff]  }
 0x214   : > { %v2920_v42 = vpop.eup %2919  ;;  %v2905_v39 = vld [vmem:[%s3671_s7 + $0x12c] ss:$28 sps:$4 sm:$0xff]  }
 0x215   : > { %v1263_v45 = vmul.f32 %v2920_v42, %v1259_v40  ;;  %2272 = vst [vmem:[%s3431_s16 + $0x28] sm:$0xff] %v2920_v42  ;;  %2719 = vmatprep.mubr.bf16.mxu0 %v1269_v41  ;;  %v2906_v40 = vld [vmem:[%s3671_s7 + $0x130] ss:$28 sps:$4 sm:$0xff]   ;;  %v2903_v41 = vld [vmem:[%s3671_s7 + $0x128] ss:$28 sps:$4 sm:$0xff]  }
 0x216   : > { %v2922_v46 = vpop.eup %2921  ;;  %v2909_v42 = vld [vmem:[%s3671_s7 + $0x164] ss:$28 sps:$4 sm:$0xff]  }
 0x217   : > { %v1264_v47 = vmul.f32 %v2922_v46, %v1260_v44  ;;  %2273 = vst [vmem:[%s3431_s16 + $0x38] sm:$0xff] %v2922_v46  ;;  %v1267_v48 = vadd.f32 %v1263_v45, %v1237_v21  ;;  %v2910_v44 = vld [vmem:[%s3671_s7 + $0x168] ss:$28 sps:$4 sm:$0xff]   ;;  %v2907_v45 = vld [vmem:[%s3671_s7 + $0x160] ss:$28 sps:$4 sm:$0xff]  }
 0x218   : > { %v2913_v46 = vld [vmem:[%s3671_s7 + $0x19c] ss:$28 sps:$4 sm:$0xff]  }
 0x219   : > { %v1268_v49 = vadd.f32 %v1264_v47, %v1241_v25  ;;  %v2883_v25 = vld [vmem:[%s3671_s7 + $0x10] ss:$28 sps:$4 sm:$0xff]   ;;  %v2914_v47 = vld [vmem:[%s3671_s7 + $0x1a0] ss:$28 sps:$4 sm:$0xff]  }
 0x21b   : > { %v1270_v51 = vpack.c.bf16 %v1268_v49, %v1267_v48  ;;  %v2911_v48 = vld [vmem:[%s3671_s7 + $0x198] ss:$28 sps:$4 sm:$0xff]   ;;  %v1473_v49 = vsub.s32 2, %v3416_v2 }
 0x21d   : > { %2720 = vmatmul.mubr.bf16.vlgmr.msra.gmra.mrb[16].mxu0 %v1270_v51  ;;  %v1477_v51 = vsub.s32 3, %v3416_v2 }
 0x21e   : > { %1840 = vmatpush1.bf16.msra.mxu0 %v2838_v50  ;;  %1871 = vmatprep.mubr.bf16.mxu0 %v3043_v43  ;;  %v3592_v50 = vld [vmem:[%s3672_s8] sm:$0xff] }
 0x21f   : > { %1841 = vmatprep.subr.bf16.mxu0 %v2846_v52  ;;  %v1466_v52 = vrot.slane %v3592_v50, %v1104_v3 }
 0x222   : > { %1842 = vmatpush1.bf16.msra.mxu0 %v2844_v53  ;;  %v3599_v53 = vrot.slane %v3592_v50, %v1473_v49 }
 0x223   : > { %1843 = vmatprep.subr.bf16.mxu0 %v2852_v54  ;;  %v3607_v54 = vrot.slane %v3592_v50, %v1477_v51 }
 0x226   : > { %1844 = vmatpush1.bf16.msra.mxu0 %v2850_v55 }
 0x227   : > { %1845 = vmatprep.subr.bf16.mxu0 %v2858_v56 }
 0x22a   : > { %1846 = vmatpush1.bf16.msra.mxu0 %v2856_v57 }
 0x22b   : > { %1847 = vmatprep.subr.bf16.mxu0 %v2864_v58 }
 0x22e   : > { %1848 = vmatpush1.bf16.msra.mxu0 %v2862_v59 }
 0x22f   : > { %1849 = vmatprep.subr.bf16.mxu0 %v2870_v60 }
 0x232   : > { %1850 = vmatpush1.bf16.msra.mxu0 %v2868_v61 }
 0x233   : > { %1851 = vmatprep.subr.bf16.mxu0 %v2876_v63 }
 0x236   : > { %1852 = vmatpush1.bf16.msra.mxu0 %v2874_v1 }
 0x237   : > { %1853 = vmatprep.subr.bf16.mxu0 %v2882_v6 }
 0x23a   : > { %1854 = vmatpush1.bf16.msra.mxu0 %v2880_v8 }
 0x23b   : > { %2723 = vmatprep.subr.bf16.mxu0 %v2886_v10 }
 0x2f0   : > { %v2721_v12 = vpop.f32.mrb[16].mxu0 }
 0x2f1   : > { %v1385_v13 = vadd.f32 %v2721_v12, %v2462_v11  ;;  %v1376_v14 = vpop.f32.mrb[17].mxu0 }
 0x2f2   : > { %v1377_v15 = vadd.f32 %v2462_v11, %v1376_v14  ;;  %v2722_v16 = vpop.f32.mrb[18].mxu0 }
 0x2f3   : > { %v1388_v17 = vadd.f32 %v2722_v16, %v2462_v11  ;;  %v1379_v18 = vpop.f32.mrb[19].mxu0  ;;  %v1393_v20 = vmax.f32 %v1385_v13, 0.0 }
 0x2f4   : > { %v1380_v19 = vadd.f32 %v2462_v11, %v1379_v18  ;;  %v1391_v22 = vmax.f32 %v1377_v15, 0.0 }
 0x2f5   : > { %v1394_v21 = vmax.f32 %v1388_v17, 0.0 }
 0x2f6   : > { %v1392_v23 = vmax.f32 %v1380_v19, 0.0 }
 0x2f7   : > { %v3512_v24 = vpack.c.bf16 %v1394_v21, %v1393_v20 }
 0x2f8   : > { %v1395_v26 = vpack.c.bf16 %v1392_v23, %v1391_v22 }
 0x2fa   : > { %1819 = vmatmul.mubr.bf16.vlgmr.msra.gmra.mrb[20].mxu1 %v1395_v26  ;;  %1872 = vmatmul.mubr.bf16.vlgmr.msra.gmra.mrb[20].mxu0 %v1395_v26 }
 0x2fb   : > { %1893 = vmatpush1.bf16.msra.mxu1 %v2883_v25  ;;  %2724 = vmatpush3.bf16.msra.mxu0 %v2886_v10 }
 0x2fc   : > { %1894 = vmatprep.subr.bf16.mxu1 %v2889_v27  ;;  %2725 = vmatprep.subr.bf16.mxu0 %v2890_v28 }
 0x2fd   : > { %1828 = vmatprep.mubr.bf16.mxu1 %v3043_v43  ;;  %1881 = vmatprep.mubr.bf16.mxu0 %v3043_v43 }
 0x2ff   : > { %1895 = vmatpush1.bf16.msra.mxu1 %v2887_v29  ;;  %2726 = vmatpush3.bf16.msra.mxu0 %v2890_v28 }
 0x300   : > { %1896 = vmatprep.subr.bf16.mxu1 %v2893_v30  ;;  %2727 = vmatprep.subr.bf16.mxu0 %v2894_v31 }
 0x302   : > { %1829 = vmatmul.mubr.bf16.gmra.mrb[24].mxu1 %v3512_v24  ;;  %1882 = vmatmul.mubr.bf16.gmra.mrb[24].mxu0 %v3512_v24 }
 0x303   : > { %1897 = vmatpush1.bf16.msra.mxu1 %v2891_v32  ;;  %2728 = vmatpush3.bf16.msra.mxu0 %v2894_v31 }
 0x304   : > { %2739 = vmatprep.mubr.bf16.mxu0 %v1395_v26  ;;  %1898 = vmatprep.subr.bf16.mxu1 %v2897_v33 }
 0x305   : > { %2729 = vmatprep.subr.bf16.mxu0 %v2898_v34  ;;  %1924 = vmatprep.mubr.bf16.mxu1 %v3043_v43 }
 0x307   : > { %1899 = vmatpush1.bf16.msra.mxu1 %v2895_v35  ;;  %2730 = vmatpush3.bf16.msra.mxu0 %v2898_v34 }
 0x308   : > { %1900 = vmatprep.subr.bf16.mxu1 %v2901_v36  ;;  %2731 = vmatprep.subr.bf16.mxu0 %v2902_v37 }
 0x30b   : > { %1901 = vmatpush1.bf16.msra.mxu1 %v2899_v38  ;;  %2732 = vmatpush3.bf16.msra.mxu0 %v2902_v37 }
 0x30c   : > { %1902 = vmatprep.subr.bf16.mxu1 %v2905_v39  ;;  %2733 = vmatprep.subr.bf16.mxu0 %v2906_v40 }
 0x30f   : > { %1903 = vmatpush1.bf16.msra.mxu1 %v2903_v41  ;;  %2734 = vmatpush3.bf16.msra.mxu0 %v2906_v40 }
 0x310   : > { %1904 = vmatprep.subr.bf16.mxu1 %v2909_v42  ;;  %2735 = vmatprep.subr.bf16.mxu0 %v2910_v44 }
 0x313   : > { %1905 = vmatpush1.bf16.msra.mxu1 %v2907_v45  ;;  %2736 = vmatpush3.bf16.msra.mxu0 %v2910_v44 }
 0x314   : > { %1906 = vmatprep.subr.bf16.mxu1 %v2913_v46  ;;  %2737 = vmatprep.subr.bf16.mxu0 %v2914_v47 }
 0x317   : > { %1907 = vmatpush1.bf16.msra.mxu1 %v2911_v48  ;;  %2738 = vmatpush3.bf16.msra.mxu0 %v2914_v47 }
 0x31a   : > { %1925 = vmatmul.mubr.bf16.vlgmr.msra.gmra.mrb[28].mxu1 %v1395_v26  ;;  %2740 = vmatmul.mubr.bf16.vlgmr.msra.gmra.mrb[28].mxu0 %v3512_v24 }
 0x31b   : > { %1934 = vmatprep.mubr.bf16.mxu1 %v3043_v43  ;;  %v3604_v43 = vrot.slane %v3592_v50, %v1108_v5 }
 0x322   : > { %1935 = vmatmul.mubr.bf16.gmra.mrb[32].mxu1 %v3512_v24 }
 0x3cd   : > { %v1820_v55 = vpop.f32.mrb[20].mxu1  ;;  %v1873_v56 = vpop.f32.mrb[20].mxu0 }
 0x3ce   : > { %v1821_v57 = vadd.f32 %v1820_v55, %v1466_v52  ;;  %v1874_v58 = vadd.f32 %v1873_v56, %v3599_v53  ;;  %v1822_v59 = vpop.f32.mrb[21].mxu1  ;;  %v1875_v60 = vpop.f32.mrb[21].mxu0 }
 0x3cf   : > { %v1823_v3 = vadd.f32 %v1822_v59, %v3604_v43  ;;  %v1876_v61 = vadd.f32 %v1875_v60, %v3607_v54  ;;  %v1824_v62 = vpop.f32.mrb[22].mxu1  ;;  %v1877_v63 = vpop.f32.mrb[22].mxu0  ;;  %v1481_v59 = vsub.s32 4, %v3416_v2 }
 0x3d0   : > { %v2527_v0 = vmul.f32 -1.442695, %v1821_v57  ;;  %v2529_v1 = vmul.f32 -1.442695, %v1874_v58  ;;  %v1825_v5 = vadd.f32 %v1824_v62, %v1466_v52  ;;  %v1878_v4 = vadd.f32 %v1877_v63, %v3599_v53  ;;  %v1826_v6 = vpop.f32.mrb[23].mxu1  ;;  %v1879_v7 = vpop.f32.mrb[23].mxu0 }
 0x3d1   : > { %v2528_v8 = vmul.f32 -1.442695, %v1823_v3  ;;  %v2530_v9 = vmul.f32 -1.442695, %v1876_v61  ;;  %v1827_v10 = vadd.f32 %v1826_v6, %v3604_v43  ;;  %v1880_v11 = vadd.f32 %v1879_v7, %v3607_v54 }
 0x3d2   : > { %2923 = vpow2.f32 %v2527_v0  ;;  %v2534_v12 = vmul.f32 -1.442695, %v1825_v5  ;;  %v2536_v13 = vmul.f32 -1.442695, %v1878_v4  ;;  %v1489_v62 = vsub.s32 6, %v3416_v2 }
 0x3d3   : > { %2925 = vpow2.f32 %v2529_v1  ;;  %v2535_v14 = vmul.f32 -1.442695, %v1827_v10  ;;  %v2537_v15 = vmul.f32 -1.442695, %v1880_v11 }
 0x3d4   : > { %2927 = vpow2.f32 %v2528_v8 }
 0x3d5   : > { %2929 = vpow2.f32 %v2530_v9  ;;  %v1830_v16 = vpop.f32.mrb[24].mxu1  ;;  %v1883_v17 = vpop.f32.mrb[24].mxu0  ;;  %v1490_v9 = vrot.slane %v3592_v50, %v1489_v62 }
 0x3d6   : > { %2931 = vpow2.f32 %v2534_v12  ;;  %v1831_v18 = vadd.f32 %v1830_v16, %v1466_v52  ;;  %v1884_v19 = vadd.f32 %v1883_v17, %v3599_v53  ;;  %v1832_v20 = vpop.f32.mrb[25].mxu1  ;;  %v1885_v21 = vpop.f32.mrb[25].mxu0 }
 0x3d7   : > { %2933 = vpow2.f32 %v2536_v13  ;;  %v1833_v22 = vadd.f32 %v1832_v20, %v3604_v43  ;;  %v1886_v23 = vadd.f32 %v1885_v21, %v3607_v54  ;;  %v1834_v24 = vpop.f32.mrb[26].mxu1  ;;  %v1887_v25 = vpop.f32.mrb[26].mxu0 }
 0x3d8   : > { %2935 = vpow2.f32 %v2535_v14  ;;  %v2541_v26 = vmul.f32 -1.442695, %v1831_v18  ;;  %v2543_v27 = vmul.f32 -1.442695, %v1884_v19  ;;  %v1835_v28 = vadd.f32 %v1834_v24, %v1466_v52  ;;  %v1836_v29 = vpop.f32.mrb[27].mxu1  ;;  %v1889_v30 = vpop.f32.mrb[27].mxu0 }
 0x3d9   : > { %2937 = vpow2.f32 %v2537_v15  ;;  %v2542_v31 = vmul.f32 -1.442695, %v1833_v22  ;;  %v2544_v32 = vmul.f32 -1.442695, %v1886_v23  ;;  %v1888_v55 = vadd.f32 %v1887_v25, %v3599_v53 }
 0x3da   : > { %2939 = vpow2.f32 %v2541_v26  ;;  %v2548_v33 = vmul.f32 -1.442695, %v1835_v28  ;;  %v1837_v58 = vadd.f32 %v1836_v29, %v3604_v43  ;;  %v1890_v61 = vadd.f32 %v1889_v30, %v3607_v54 }
 0x3db   : > { %2941 = vpow2.f32 %v2543_v27  ;;  %v1485_v53 = vsub.s32 5, %v3416_v2  ;;  %v2550_v4 = vmul.f32 -1.442695, %v1888_v55  ;;  %v3626_v54 = vrot.slane %v3592_v50, %v1481_v59 }
 0x3dc   : > { %v2924_v34 = vpop.eup %2923  ;;  %2943 = vpow2.f32 %v2542_v31  ;;  %v2549_v6 = vmul.f32 -1.442695, %v1837_v58  ;;  %v2551_v8 = vmul.f32 -1.442695, %v1890_v61 }
 0x3dd   : > { %v2926_v35 = vpop.eup %2925  ;;  %v2078_v36 = vadd.f32 1.0, %v2924_v34  ;;  %2945 = vpow2.f32 %v2544_v32  ;;  %v3635_v11 = vrot.slane %v3592_v50, %v1485_v53 }
 0x3de   : > { %v2928_v37 = vpop.eup %2927  ;;  %v2080_v38 = vadd.f32 1.0, %v2926_v35  ;;  %2947 = vpow2.f32 %v2548_v33 }
 0x3df   : > { %v2930_v39 = vpop.eup %2929  ;;  %2949 = vrcp.f32 %v2078_v36  ;;  %v2079_v40 = vadd.f32 1.0, %v2928_v37 }
 0x3e0   : > { %v2932_v41 = vpop.eup %2931  ;;  %2951 = vrcp.f32 %v2080_v38  ;;  %v2081_v42 = vadd.f32 1.0, %v2930_v39 }
 0x3e1   : > { %v2934_v44 = vpop.eup %2933  ;;  %2953 = vrcp.f32 %v2079_v40  ;;  %v2085_v45 = vadd.f32 1.0, %v2932_v41 }
 0x3e2   : > { %v2936_v46 = vpop.eup %2935  ;;  %2955 = vrcp.f32 %v2081_v42  ;;  %v2087_v47 = vadd.f32 1.0, %v2934_v44 }
 0x3e3   : > { %v2938_v48 = vpop.eup %2937  ;;  %2957 = vrcp.f32 %v2085_v45  ;;  %v2086_v49 = vadd.f32 1.0, %v2936_v46 }
 0x3e4   : > { %v2940_v51 = vpop.eup %2939  ;;  %2959 = vrcp.f32 %v2087_v47  ;;  %v2088_v52 = vadd.f32 1.0, %v2938_v48 }
 0x3e5   : > { %v2942_v56 = vpop.eup %2941  ;;  %2961 = vrcp.f32 %v2086_v49  ;;  %v2092_v57 = vadd.f32 1.0, %v2940_v51 }
 0x3e6   : > { %v2944_v60 = vpop.eup %2943  ;;  %2963 = vrcp.f32 %v2088_v52  ;;  %v2094_v3 = vadd.f32 1.0, %v2942_v56 }
 0x3e7   : > { %v2946_v63 = vpop.eup %2945  ;;  %2965 = vrcp.f32 %v2092_v57  ;;  %v2093_v0 = vadd.f32 1.0, %v2944_v60 }
 0x3e8   : > { %v2948_v1 = vpop.eup %2947  ;;  %2967 = vrcp.f32 %v2094_v3  ;;  %v2095_v5 = vadd.f32 1.0, %v2946_v63 }
 0x3e9   : > { %v2950_v43 = vpop.eup %2949  ;;  %2969 = vrcp.f32 %v2093_v0  ;;  %v2099_v2 = vadd.f32 1.0, %v2948_v1 }
 0x3ea   : > { %v2952_v7 = vpop.eup %2951  ;;  %2971 = vrcp.f32 %v2095_v5 }
 0x3eb   : > { %v2954_v10 = vpop.eup %2953  ;;  %2973 = vpow2.f32 %v2550_v4 }
 0x3ec   : > { %v2956_v12 = vpop.eup %2955  ;;  %v2574_v13 = vpack.c.bf16 %v2954_v10, %v2950_v43  ;;  %2975 = vpow2.f32 %v2549_v6 }
 0x3ed   : > { %v2958_v14 = vpop.eup %2957  ;;  %v2575_v15 = vpack.c.bf16 %v2956_v12, %v2952_v7  ;;  %v1926_v16 = vpop.f32.mrb[28].mxu1  ;;  %2977 = vpow2.f32 %v2551_v8 }
 0x3ee   : > { %v2741_v17 = vpop.f32.mrb[28].mxu0  ;;  %v2960_v18 = vpop.eup %2959  ;;  %2250 = vst [vmem:[%s3632_s28] sm:$0xff] %v2574_v13  ;;  %v1927_v19 = vadd.f32 %v1926_v16, %v3626_v54  ;;  %2979 = vrcp.f32 %v2099_v2 }
 0x3ef   : > { %v1988_v20 = vadd.f32 %v2741_v17, %v1490_v9  ;;  %v1928_v21 = vpop.f32.mrb[29].mxu1  ;;  %v1979_v22 = vpop.f32.mrb[29].mxu0  ;;  %2251 = vst [vmem:[%s3632_s28 + $0x8] sm:$0xff] %v2575_v15 }
 0x3f0   : > { %v2962_v23 = vpop.eup %2961  ;;  %v1929_v50 = vadd.f32 %v1928_v21, %v3635_v11  ;;  %v1980_v24 = vadd.f32 %v1979_v22, %v1490_v9  ;;  %v1930_v25 = vpop.f32.mrb[30].mxu1  ;;  %v2531_v29 = vmul.f32 -1.442695, %v1927_v19 }
 0x3f1   : > { %v2742_v26 = vpop.f32.mrb[30].mxu0  ;;  %v2964_v27 = vpop.eup %2963  ;;  %v2578_v28 = vpack.c.bf16 %v2962_v23, %v2958_v14  ;;  %v2547_v30 = vmul.f32 -1.442695, %v1988_v20  ;;  %v1931_v31 = vadd.f32 %v1930_v25, %v3626_v54 }
 0x3f2   : > { %v1932_v32 = vpop.f32.mrb[31].mxu1  ;;  %v1982_v33 = vpop.f32.mrb[31].mxu0  ;;  %v2579_v35 = vpack.c.bf16 %v2964_v27, %v2960_v18  ;;  %v2532_v36 = vmul.f32 -1.442695, %v1929_v50  ;;  %v2533_v37 = vmul.f32 -1.442695, %v1980_v24  ;;  %v1991_v38 = vadd.f32 %v2742_v26, %v1490_v9 }
 0x3f3   : > { %v2966_v34 = vpop.eup %2965  ;;  %2254 = vst [vmem:[%s3632_s28 + $0x1c] sm:$0xff] %v2578_v28  ;;  %2981 = vpow2.f32 %v2531_v29  ;;  %v2538_v40 = vmul.f32 -1.442695, %v1931_v31  ;;  %v1933_v41 = vadd.f32 %v1932_v32, %v3635_v11  ;;  %v1983_v48 = vadd.f32 %v1982_v33, %v1490_v9 }
 0x3f4   : > { %v2968_v39 = vpop.eup %2967  ;;  %2255 = vst [vmem:[%s3632_s28 + $0x24] sm:$0xff] %v2579_v35  ;;  %2983 = vpow2.f32 %v2547_v30  ;;  %v2554_v44 = vmul.f32 -1.442695, %v1991_v38 }
 0x3f5   : > { %v2970_v42 = vpop.eup %2969  ;;  %2985 = vpow2.f32 %v2532_v36  ;;  %v2539_v47 = vmul.f32 -1.442695, %v1933_v41  ;;  %v1936_v51 = vpop.f32.mrb[32].mxu1  ;;  %v2540_v62 = vmul.f32 -1.442695, %v1983_v48 }
 0x3f6   : > { %v2972_v45 = vpop.eup %2971  ;;  %v2582_v46 = vpack.c.bf16 %v2970_v42, %v2966_v34  ;;  %2987 = vpow2.f32 %v2533_v37  ;;  %v1937_v55 = vadd.f32 %v1936_v51, %v3626_v54  ;;  %v1938_v56 = vpop.f32.mrb[33].mxu1 }
 0x3f7   : > { %v2583_v49 = vpack.c.bf16 %v2972_v45, %v2968_v39  ;;  %v2974_v52 = vpop.eup %2973  ;;  %2989 = vpow2.f32 %v2538_v40  ;;  %v1939_v59 = vadd.f32 %v1938_v56, %v3635_v11  ;;  %v1940_v60 = vpop.f32.mrb[34].mxu1 }
 0x3f8   : > { %2258 = vst [vmem:[%s3632_s28 + $0x38] sm:$0xff] %v2582_v46  ;;  %v2976_v57 = vpop.eup %2975  ;;  %v2101_v58 = vadd.f32 1.0, %v2974_v52  ;;  %2991 = vpow2.f32 %v2554_v44  ;;  %v1942_v63 = vpop.f32.mrb[35].mxu1  ;;  %v2545_v1 = vmul.f32 -1.442695, %v1937_v55  ;;  %v1941_v8 = vadd.f32 %v1940_v60, %v3626_v54 }
 0x3f9   : > { %2259 = vst [vmem:[%s3632_s28 + $0x40] sm:$0xff] %v2583_v49  ;;  %v2978_v3 = vpop.eup %2977  ;;  %v2100_v61 = vadd.f32 1.0, %v2976_v57  ;;  %2993 = vpow2.f32 %v2539_v47  ;;  %v2546_v5 = vmul.f32 -1.442695, %v1939_v59  ;;  %v1943_v2 = vadd.f32 %v1942_v63, %v3635_v11 }
 0x3fa   : > { %v2980_v0 = vpop.eup %2979  ;;  %2995 = vrcp.f32 %v2101_v58  ;;  %v2102_v53 = vadd.f32 1.0, %v2978_v3  ;;  %v2552_v18 = vmul.f32 -1.442695, %v1941_v8 }
 0x3fb   : > { %2997 = vrcp.f32 %v2100_v61  ;;  %v2553_v54 = vmul.f32 -1.442695, %v1943_v2 }
 0x3fc   : > { %2999 = vrcp.f32 %v2102_v53 }
 0x3fd   : > { %v2982_v4 = vpop.eup %2981  ;;  %3001 = vpow2.f32 %v2540_v62 }
 0x3fe   : > { %v2984_v43 = vpop.eup %2983  ;;  %v2082_v6 = vadd.f32 1.0, %v2982_v4  ;;  %3003 = vpow2.f32 %v2545_v1 }
 0x3ff   : > { %v2986_v7 = vpop.eup %2985  ;;  %3005 = vpow2.f32 %v2546_v5  ;;  %v2098_v13 = vadd.f32 1.0, %v2984_v43 }
 0x400   : > { %v2988_v9 = vpop.eup %2987  ;;  %3007 = vrcp.f32 %v2082_v6  ;;  %v2083_v10 = vadd.f32 1.0, %v2986_v7 }
 0x401   : > { %v2990_v12 = vpop.eup %2989  ;;  %v2084_v14 = vadd.f32 1.0, %v2988_v9 }
 0x402   : > { %v2992_v15 = vpop.eup %2991  ;;  %3009 = vrcp.f32 %v2083_v10  ;;  %v2089_v16 = vadd.f32 1.0, %v2990_v12 }
 0x403   : > { %v2994_v17 = vpop.eup %2993  ;;  %3011 = vrcp.f32 %v2084_v14  ;;  %v2105_v22 = vadd.f32 1.0, %v2992_v15 }
 0x404   : > { %v2996_v19 = vpop.eup %2995  ;;  %3013 = vrcp.f32 %v2089_v16  ;;  %v2090_v20 = vadd.f32 1.0, %v2994_v17 }
 0x405   : > { %v2998_v21 = vpop.eup %2997  ;;  %3015 = vrcp.f32 %v2098_v13 }
 0x406   : > { %v3000_v23 = vpop.eup %2999  ;;  %v2586_v11 = vpack.c.bf16 %v2998_v21, %v2980_v0  ;;  %3017 = vrcp.f32 %v2090_v20 }
 0x407   : > { %v3002_v50 = vpop.eup %3001  ;;  %v2587_v24 = vpack.c.bf16 %v3000_v23, %v2996_v19  ;;  %3019 = vpow2.f32 %v2552_v18 }
 0x408   : > { %v3004_v25 = vpop.eup %3003  ;;  %2262 = vst [vmem:[%s3632_s28 + $0x54] sm:$0xff] %v2586_v11  ;;  %v2091_v26 = vadd.f32 1.0, %v3002_v50  ;;  %3021 = vpow2.f32 %v2553_v54 }
 0x409   : > { %v3006_v27 = vpop.eup %3005  ;;  %2263 = vst [vmem:[%s3632_s28 + $0x5c] sm:$0xff] %v2587_v24  ;;  %3023 = vrcp.f32 %v2105_v22  ;;  %v2096_v28 = vadd.f32 1.0, %v3004_v25 }
 0x40a   : > { %v3008_v29 = vpop.eup %3007  ;;  %3025 = vrcp.f32 %v2091_v26  ;;  %v2097_v30 = vadd.f32 1.0, %v3006_v27 }
 0x40b   : > { %3027 = vrcp.f32 %v2096_v28 }
 0x40c   : > { %v3010_v31 = vpop.eup %3009  ;;  %3029 = vrcp.f32 %v2097_v30 }
 0x40d   : > { %v3012_v32 = vpop.eup %3011  ;;  %v2576_v33 = vpack.c.bf16 %v3010_v31, %v3008_v29 }
 0x40e   : > { %v3014_v34 = vpop.eup %3013  ;;  %v2577_v35 = vpack.c.bf16 %v3012_v32, %v3012_v32 }
 0x40f   : > { %v3016_v36 = vpop.eup %3015  ;;  %2252 = vst [vmem:[%s3632_s28 + $0x10] sm:$0xff] %v2576_v33 }
 0x410   : > { %v3018_v37 = vpop.eup %3017  ;;  %2253 = vst [vmem:[%s3632_s28 + $0x18] sm:$0xf] %v2577_v35  ;;  %v2585_v49 = vpack.c.bf16 %v3016_v36, %v3016_v36 }
 0x411   : > { %v3020_v38 = vpop.eup %3019  ;;  %v2580_v39 = vpack.c.bf16 %v3018_v37, %v3014_v34 }
 0x412   : > { %v3022_v40 = vpop.eup %3021  ;;  %v2103_v41 = vadd.f32 1.0, %v3020_v38  ;;  %2261 = vst [vmem:[%s3632_s28 + $0x50] sm:$0xf] %v2585_v49 }
 0x413   : > { %v3024_v42 = vpop.eup %3023  ;;  %2256 = vst [vmem:[%s3632_s28 + $0x2c] sm:$0xff] %v2580_v39  ;;  %v2104_v44 = vadd.f32 1.0, %v3022_v40 }
 0x414   : > { %v3026_v45 = vpop.eup %3025  ;;  %3031 = vrcp.f32 %v2103_v41  ;;  %v2589_v51 = vpack.c.bf16 %v3024_v42, %v3024_v42 }
 0x415   : > { %v3028_v46 = vpop.eup %3027  ;;  %v2581_v47 = vpack.c.bf16 %v3026_v45, %v3026_v45  ;;  %3033 = vrcp.f32 %v2104_v44 }
 0x416   : > { %v3030_v48 = vpop.eup %3029  ;;  %2265 = vst [vmem:[%s3632_s28 + $0x6c] sm:$0xf] %v2589_v51 }
 0x417   : > { %2257 = vst [vmem:[%s3632_s28 + $0x34] sm:$0xf] %v2581_v47  ;;  %v2584_v52 = vpack.c.bf16 %v3030_v48, %v3028_v46 }
 0x419   : > { %2260 = vst [vmem:[%s3632_s28 + $0x48] sm:$0xff] %v2584_v52 }
 0x41e   : > { %v3032_v55 = vpop.eup %3031 }
 0x41f   : > { %v3034_v56 = vpop.eup %3033 }
 0x420   : > { %v2588_v57 = vpack.c.bf16 %v3034_v56, %v3032_v55 }
 0x422   : > { %2264 = vst [vmem:[%s3632_s28 + $0x64] sm:$0xff] %v2588_v57 }
 0x423 PF: > { %s22_s17 = sadd.s32 1, %s3041_s17  }
 0x424   : > { %p19_p4 = scmp.ge.s32.totalorder %s22_s17, 4  }
 0x426   :  { %21 = sbr.rel (!%p19_p4) target bundleno = 1 (0x1), region = 105 }

</bundles_post_ra>
